<compile_context>
chip_gen: v7x
topology: tpu7x:2x2x1
jax: 0.10.0
libtpu: 0.0.40
codegen_flags: <defaults>
</compile_context>

<pallas_src>
import numpy as np
import jax
import jax.numpy as jnp
from jax.experimental import pallas as pl
from jax.experimental.pallas import tpu as pltpu

EPS = 1e-5                      # nn.BatchNorm2d default
LANE = 128                      # TPU lane width
_MM_DTYPE = jnp.bfloat16        # matmul-input dtype (f32 accumulation on MXU)


def _round_up(x, m):
    return (x + m - 1) // m * m


# ------------------------------ Pallas kernels ------------------------------

def _conv_stats_kernel(p_ref, w_ref, y_ref, stats_ref):
    """(TM, Kp) @ (Kp, NC) tile matmul + per-channel sum / sum-sq accumulation.

    stats_ref is a grid-resident (8, NC) output block (constant block index):
    row 0 = sum(y), row 1 = sum(y*y), rows 2..7 unused (kept at zero).
    """
    y = jnp.dot(p_ref[...], w_ref[...], preferred_element_type=jnp.float32)
    y_ref[...] = y

    @pl.when(pl.program_id(0) == 0)
    def _():
        stats_ref[...] = jnp.zeros_like(stats_ref)

    stats_ref[0:1, :] += jnp.sum(y, axis=0, keepdims=True)
    stats_ref[1:2, :] += jnp.sum(y * y, axis=0, keepdims=True)


def _affine_relu_kernel(y_ref, sc_ref, sh_ref, o_ref):
    """out = relu(y * scale + shift)  (scale/shift broadcast over rows)."""
    o_ref[...] = jnp.maximum(
        y_ref[...] * sc_ref[...] + sh_ref[...], 0.0).astype(o_ref.dtype)


def _affine_skip_add_relu_kernel(y2_ref, sc2_ref, sh2_ref,
                                 ysk_ref, scs_ref, shs_ref, o_ref):
    """out = relu((y2*sc2+sh2) + (y_skip*sc_s+sh_s))."""
    h = y2_ref[...] * sc2_ref[...] + sh2_ref[...]
    s = ysk_ref[...] * scs_ref[...] + shs_ref[...]
    o_ref[...] = jnp.maximum(h + s, 0.0).astype(o_ref.dtype)


def _affine_addx_relu_kernel(y2_ref, sc2_ref, sh2_ref, x_ref, o_ref):
    """out = relu((y2*sc2+sh2) + x)  (identity skip)."""
    h = y2_ref[...] * sc2_ref[...] + sh2_ref[...]
    o_ref[...] = jnp.maximum(h + x_ref[...], 0.0).astype(o_ref.dtype)


# --------------------------- pallas_call wrappers ----------------------------

def _conv_stats(p, wmat, *, tm):
    mp, kp = p.shape
    nc = wmat.shape[1]
    cost = pl.CostEstimate(
        flops=2 * mp * kp * nc,
        transcendentals=0,
        bytes_accessed=int(p.size) * p.dtype.itemsize
        + int(wmat.size) * wmat.dtype.itemsize + mp * nc * 4 + 8 * nc * 4)
    return pl.pallas_call(
        _conv_stats_kernel,
        out_shape=(jax.ShapeDtypeStruct((mp, nc), jnp.float32),
                   jax.ShapeDtypeStruct((8, nc), jnp.float32)),
        grid_spec=pltpu.PrefetchScalarGridSpec(
            num_scalar_prefetch=0,
            grid=(mp // tm,),
            in_specs=[pl.BlockSpec((tm, kp), lambda i: (i, 0)),
                      pl.BlockSpec((kp, nc), lambda i: (0, 0))],
            out_specs=[pl.BlockSpec((tm, nc), lambda i: (i, 0)),
                       pl.BlockSpec((8, nc), lambda i: (0, 0))]),
        compiler_params=pltpu.CompilerParams(
            dimension_semantics=("arbitrary",)),      # stats reduction over M
        cost_estimate=cost,
    )(p, wmat)


def _affine_relu(y, scale, shift, *, tm, out_dtype, col_block=0):
    mp = y.shape[0]
    cp = scale.shape[1]
    cost = pl.CostEstimate(
        flops=3 * mp * cp, transcendentals=0,
        bytes_accessed=mp * cp * 4 + mp * cp * jnp.dtype(out_dtype).itemsize)
    return pl.pallas_call(
        _affine_relu_kernel,
        out_shape=jax.ShapeDtypeStruct((mp, cp), out_dtype),
        grid_spec=pltpu.PrefetchScalarGridSpec(
            num_scalar_prefetch=0,
            grid=(mp // tm,),
            in_specs=[pl.BlockSpec((tm, cp), lambda i: (i, col_block)),
                      pl.BlockSpec((1, cp), lambda i: (0, 0)),
                      pl.BlockSpec((1, cp), lambda i: (0, 0))],
            out_specs=pl.BlockSpec((tm, cp), lambda i: (i, 0))),
        compiler_params=pltpu.CompilerParams(dimension_semantics=("parallel",)),
        cost_estimate=cost,
    )(y, scale, shift)


def _affine_skip_add_relu(y2, sc2, sh2, y1, scs, shs, *, tm):
    mp, cp = y2.shape
    cost = pl.CostEstimate(flops=7 * mp * cp, transcendentals=0,
                           bytes_accessed=3 * mp * cp * 4)
    return pl.pallas_call(
        _affine_skip_add_relu_kernel,
        out_shape=jax.ShapeDtypeStruct((mp, cp), jnp.float32),
        grid_spec=pltpu.PrefetchScalarGridSpec(
            num_scalar_prefetch=0,
            grid=(mp // tm,),
            in_specs=[pl.BlockSpec((tm, cp), lambda i: (i, 0)),  # conv2 result
                      pl.BlockSpec((1, cp), lambda i: (0, 0)),
                      pl.BlockSpec((1, cp), lambda i: (0, 0)),
                      pl.BlockSpec((tm, cp), lambda i: (i, 1)),  # skip half of y1
                      pl.BlockSpec((1, cp), lambda i: (0, 0)),
                      pl.BlockSpec((1, cp), lambda i: (0, 0))],
            out_specs=pl.BlockSpec((tm, cp), lambda i: (i, 0))),
        compiler_params=pltpu.CompilerParams(dimension_semantics=("parallel",)),
        cost_estimate=cost,
    )(y2, sc2, sh2, y1, scs, shs)


def _affine_addx_relu(y2, sc2, sh2, x_pad, *, tm):
    mp, cp = y2.shape
    cost = pl.CostEstimate(flops=4 * mp * cp, transcendentals=0,
                           bytes_accessed=3 * mp * cp * 4)
    return pl.pallas_call(
        _affine_addx_relu_kernel,
        out_shape=jax.ShapeDtypeStruct((mp, cp), jnp.float32),
        grid_spec=pltpu.PrefetchScalarGridSpec(
            num_scalar_prefetch=0,
            grid=(mp // tm,),
            in_specs=[pl.BlockSpec((tm, cp), lambda i: (i, 0)),
                      pl.BlockSpec((1, cp), lambda i: (0, 0)),
                      pl.BlockSpec((1, cp), lambda i: (0, 0)),
                      pl.BlockSpec((tm, cp), lambda i: (i, 0))],
            out_specs=pl.BlockSpec((tm, cp), lambda i: (i, 0))),
        compiler_params=pltpu.CompilerParams(dimension_semantics=("parallel",)),
        cost_estimate=cost,
    )(y2, sc2, sh2, x_pad)


# --------------------------------- glue --------------------------------------

def _im2col_3x3(x_nhwc):
    # (N,H,W,C) -> (N*H*W, 9*C); column k*C + c = input pixel (h+ky-1, w+kx-1),
    # channel c, with k = ky*3 + kx (PyTorch Conv2d padding=1 semantics).
    n, h, w, c = x_nhwc.shape
    xp = jnp.pad(x_nhwc, ((0, 0), (1, 1), (1, 1), (0, 0)))
    cols = [xp[:, ky:ky + h, kx:kx + w, :] for ky in range(3) for kx in range(3)]
    return jnp.concatenate(cols, axis=-1).reshape(n * h * w, 9 * c)


def _w_oihw_to_kio(wt):
    # PyTorch Conv2d weight (Cout, Cin, 3, 3) -> (9*Cin, Cout), row = k*Cin + cin.
    cout, cin = wt.shape[0], wt.shape[1]
    return jnp.transpose(wt, (2, 3, 1, 0)).reshape(9 * cin, cout)


def _pad2(a, rows, cols):
    return jnp.pad(a, ((0, rows - a.shape[0]), (0, cols - a.shape[1])))


def _pad_vec(v, cp):
    # gamma/beta padded with zeros -> padded channels stay exactly zero.
    return jnp.pad(v.astype(jnp.float32), (0, cp - v.shape[0])).reshape(1, cp)


def _bn_affine(stats, g, b, m_real):
    """Fold training-mode BatchNorm stats into per-channel scale/shift rows.

    Tiny (1, NC) XLA op: mean = sum/m, var = sumsq/m - mean^2 (biased),
    scale = gamma*rsqrt(var+eps), shift = beta - mean*scale.  Padded channels
    (gamma = beta = 0, stats = 0) yield scale = shift = 0 exactly.
    """
    inv_m = 1.0 / m_real
    mean = stats[0:1, :] * inv_m
    var = stats[1:2, :] * inv_m - mean * mean
    scale = g * jax.lax.rsqrt(var + EPS)
    shift = b - mean * scale
    return scale, shift


def channel_compression_forward(x_nchw, params, *, tm=256):
    """Forward pass of channel_compression (stride=1; training-mode BatchNorm)."""
    n, cin, hh, ww = x_nchw.shape
    cout = params["w1"].shape[0]
    m = n * hh * ww
    cp = _round_up(cout, LANE)
    tm = min(tm, _round_up(m, 8))           # tile rows (multiple of 8)
    mp = _round_up(m, tm)                   # zero rows don't perturb BN sums
    has_conv_skip = "ws" in params

    x_nhwc = jnp.transpose(x_nchw, (0, 2, 3, 1)).astype(jnp.float32)

    # ---- stage 1: 3x3 conv1 (+ folded 1x1 skip conv) as one matmul + BN stats
    k1 = 9 * cin
    k1p = _round_up(k1, LANE)
    p1 = _pad2(_im2col_3x3(x_nhwc), mp, k1p).astype(_MM_DTYPE)

    nc1 = 2 * cp if has_conv_skip else cp
    wc1 = jnp.zeros((k1p, nc1), jnp.float32)
    wc1 = wc1.at[:k1, :cout].set(_w_oihw_to_kio(params["w1"]))
    if has_conv_skip:
        # im2col centre tap (k == 4) is x itself, so the 1x1 skip conv rides in
        # the same matmul as extra output columns (block-diagonal weight).
        wc1 = wc1.at[4 * cin:5 * cin, cp:cp + cout].set(params["ws"][:, :, 0, 0].T)
    wc1 = wc1.astype(_MM_DTYPE)

    y1, stats1 = _conv_stats(p1, wc1, tm=tm)     # (mp, nc1) f32, (8, nc1) f32

    # ---- fold BN1 (and skip BN) stats into per-channel affine (tiny XLA glue)
    g1 = _pad_vec(params["g1"], cp)
    b1 = _pad_vec(params["b1"], cp)
    sc1, sh1 = _bn_affine(stats1[:, :cp], g1, b1, m)

    # ---- stage 2: BN1 affine + ReLU (tiled, parallel); bf16 output feeds conv2
    h1 = _affine_relu(y1, sc1, sh1, tm=tm, out_dtype=_MM_DTYPE, col_block=0)

    # ---- stage 3: 3x3 conv2 as one matmul + BN stats
    h1_img = h1[:m, :cout].reshape(n, hh, ww, cout)
    k2 = 9 * cout
    k2p = _round_up(k2, LANE)
    p2 = _pad2(_im2col_3x3(h1_img), mp, k2p).astype(_MM_DTYPE)
    wc2 = jnp.zeros((k2p, cp), jnp.float32).at[:k2, :cout].set(
        _w_oihw_to_kio(params["w2"])).astype(_MM_DTYPE)
    y2, stats2 = _conv_stats(p2, wc2, tm=tm)

    # ---- stage 4: BN2 affine (+ skip BN affine) + residual add + ReLU
    g2 = _pad_vec(params["g2"], cp)
    b2 = _pad_vec(params["b2"], cp)
    sc2, sh2 = _bn_affine(stats2, g2, b2, m)
    if has_conv_skip:
        gs = _pad_vec(params["gs"], cp)
        bs = _pad_vec(params["bs"], cp)
        scs, shs = _bn_affine(stats1[:, cp:], gs, bs, m)
        out_flat = _affine_skip_add_relu(y2, sc2, sh2, y1, scs, shs, tm=tm)
    else:   # identity skip (in_channels == out_channels, stride == 1)
        x_pad = _pad2(x_nhwc.reshape(m, cin), mp, cp)
        out_flat = _affine_addx_relu(y2, sc2, sh2, x_pad, tm=tm)

    out = out_flat[:m, :cout].reshape(n, hh, ww, cout)
    return jnp.transpose(out, (0, 3, 1, 2))


# ------------------------- pure-JAX reference check --------------------------

def _reference(x_nchw, params):
    def conv(x, wt, pad):
        return jax.lax.conv_general_dilated(
            x, wt, (1, 1), [(pad, pad), (pad, pad)],
            dimension_numbers=("NCHW", "OIHW", "NCHW"),
            precision=jax.lax.Precision.HIGHEST)

    def bn(x, g, b):
        mean = jnp.mean(x, axis=(0, 2, 3), keepdims=True)
        var = jnp.mean(jnp.square(x - mean), axis=(0, 2, 3), keepdims=True)
        return ((x - mean) * jax.lax.rsqrt(var + EPS)
                * g[None, :, None, None] + b[None, :, None, None])

    h = jax.nn.relu(bn(conv(x_nchw, params["w1"], 1), params["g1"], params["b1"]))
    h = bn(conv(h, params["w2"], 1), params["g2"], params["b2"])
    if "ws" in params:
        s = bn(conv(x_nchw, params["ws"], 0), params["gs"], params["bs"])
    else:
        s = x_nchw
    return jax.nn.relu(h + s)


if __name__ == "__main__":
    key = jax.random.PRNGKey(0)
    ks = jax.random.split(key, 12)
    fwd = jax.jit(channel_compression_forward)
    # bf16 matmul inputs (f32 accumulation) -> tolerance set accordingly.
    TOL = dict(atol=2e-2, rtol=2e-2)

    # --- case 1: in_channels != out_channels -> Conv1x1+BN skip path ---
    N, Cin, Cout, H, W = 2, 4, 8, 16, 16
    x = jax.random.normal(ks[0], (N, Cin, H, W), jnp.float32)
    params = {
        "w1": 0.3 * jax.random.normal(ks[1], (Cout, Cin, 3, 3), jnp.float32),
        "g1": 1.0 + 0.1 * jax.random.normal(ks[2], (Cout,), jnp.float32),
        "b1": 0.1 * jax.random.normal(ks[3], (Cout,), jnp.float32),
        "w2": 0.3 * jax.random.normal(ks[4], (Cout, Cout, 3, 3), jnp.float32),
        "g2": 1.0 + 0.1 * jax.random.normal(ks[5], (Cout,), jnp.float32),
        "b2": 0.1 * jax.random.normal(ks[6], (Cout,), jnp.float32),
        "ws": 0.3 * jax.random.normal(ks[7], (Cout, Cin, 1, 1), jnp.float32),
        "gs": jnp.ones((Cout,), jnp.float32),   # BatchNorm2d default init
        "bs": jnp.zeros((Cout,), jnp.float32),
    }
    out = jax.block_until_ready(fwd(x, params))
    ref = jax.block_until_ready(_reference(x, params))
    assert out.shape == (N, Cout, H, W) and out.dtype == jnp.float32
    np.testing.assert_allclose(np.asarray(out), np.asarray(ref), **TOL)

    # --- case 2: in_channels == out_channels, stride == 1 -> identity skip ---
    C = 8
    x2 = jax.random.normal(ks[8], (N, C, H, W), jnp.float32)
    params2 = {
        "w1": 0.3 * jax.random.normal(ks[9], (C, C, 3, 3), jnp.float32),
        "g1": params["g1"], "b1": params["b1"],
        "w2": 0.3 * jax.random.normal(ks[10], (C, C, 3, 3), jnp.float32),
        "g2": params["g2"], "b2": params["b2"],
    }
    out2 = jax.block_until_ready(fwd(x2, params2))
    ref2 = jax.block_until_ready(_reference(x2, params2))
    np.testing.assert_allclose(np.asarray(out2), np.asarray(ref2), **TOL)

    print("KERNEL_OK")
</pallas_src>

<mosaic_0001>
module attributes {stable_mosaic.version = 11 : i64} {
  func.func @_conv_stats_kernel(%arg0: i32, %arg1: memref<256x128xbf16, #tpu.memory_space<vmem>>, %arg2: memref<128x256xbf16, #tpu.memory_space<vmem>>, %arg3: memref<256x256xf32, #tpu.memory_space<vmem>>, %arg4: memref<8x256xf32, #tpu.memory_space<vmem>>) attributes {dimension_semantics = [#tpu.dimension_semantics<arbitrary>], iteration_bounds = array<i64: 2>, scalar_prefetch = 0 : i64, scratch_operands = 0 : i64, tpu.core_type = #tpu.core_type<tc>, window_params = [{transform_indices = @transform_0, window_bounds = array<i64: 256, 128>}, {pipeline_mode = #tpu.pipeline_mode<synchronous>, transform_indices = @transform_1, window_bounds = array<i64: 128, 256>}, {transform_indices = @transform_2, window_bounds = array<i64: 256, 256>}, {pipeline_mode = #tpu.pipeline_mode<synchronous>, transform_indices = @transform_3, window_bounds = array<i64: 8, 256>}]} {
    %c0 = arith.constant 0 : index
    %c0_0 = arith.constant 0 : index
    %0 = vector.load %arg1[%c0, %c0_0] : memref<256x128xbf16, #tpu.memory_space<vmem>>, vector<256x128xbf16>
    %c0_1 = arith.constant 0 : index
    %c0_2 = arith.constant 0 : index
    %1 = vector.load %arg2[%c0_1, %c0_2] : memref<128x256xbf16, #tpu.memory_space<vmem>>, vector<128x256xbf16>
    %cst = arith.constant dense<0.000000e+00> : vector<256x256xf32>
    %2 = tpu.matmul %0, %1, %cst {dimension_numbers = #tpu.dot_dimension_numbers<[1], [0], [0], [1], [0, 0, 1, 1], [], []>} : vector<256x128xbf16>, vector<128x256xbf16>, vector<256x256xf32> -> vector<256x256xf32>
    %c0_3 = arith.constant 0 : index
    %c0_4 = arith.constant 0 : index
    %3 = vector.load %arg3[%c0_3, %c0_4] : memref<256x256xf32, #tpu.memory_space<vmem>>, vector<256x256xf32>
    tpu.vector_store %arg3[%c0_3, %c0_4], %2 {strides = array<i32>} : memref<256x256xf32, #tpu.memory_space<vmem>>, vector<256x256xf32>,
    %c0_i32 = arith.constant 0 : i32
    %4 = arith.cmpi eq, %arg0, %c0_i32 : i32
    %5 = arith.extui %4 : i1 to i32
    %c0_i32_5 = arith.constant 0 : i32
    %6 = arith.cmpi ne, %5, %c0_i32_5 : i32
    scf.if %6 {
      %cst_15 = arith.constant 0.000000e+00 : f32
      %18 = vector.broadcast %cst_15 : f32 to vector<8x256xf32>
      %c0_16 = arith.constant 0 : index
      %c0_17 = arith.constant 0 : index
      %19 = vector.load %arg4[%c0_16, %c0_17] : memref<8x256xf32, #tpu.memory_space<vmem>>, vector<8x256xf32>
      tpu.vector_store %arg4[%c0_16, %c0_17], %18 {strides = array<i32>} : memref<8x256xf32, #tpu.memory_space<vmem>>, vector<8x256xf32>,
    } else {
    }
    %c0_6 = arith.constant 0 : index
    %c0_7 = arith.constant 0 : index
    %7 = vector.load %arg4[%c0_6, %c0_7] : memref<8x256xf32, #tpu.memory_space<vmem>>, vector<1x256xf32>
    %cst_8 = arith.constant dense<0.000000e+00> : vector<256xf32>
    %8 = vector.multi_reduction <add>, %2, %cst_8 [0] : vector<256x256xf32> to vector<256xf32>
    %9 = vector.shape_cast %8 : vector<256xf32> to vector<1x256xf32>
    %10 = arith.addf %7, %9 : vector<1x256xf32>
    %c0_9 = arith.constant 0 : index
    %c0_10 = arith.constant 0 : index
    %11 = vector.load %arg4[%c0_9, %c0_10] : memref<8x256xf32, #tpu.memory_space<vmem>>, vector<1x256xf32>
    tpu.vector_store %arg4[%c0_9, %c0_10], %10 {strides = array<i32>} : memref<8x256xf32, #tpu.memory_space<vmem>>, vector<1x256xf32>,
    %c1 = arith.constant 1 : index
    %c0_11 = arith.constant 0 : index
    %12 = vector.load %arg4[%c1, %c0_11] : memref<8x256xf32, #tpu.memory_space<vmem>>, vector<1x256xf32>
    %13 = arith.mulf %2, %2 : vector<256x256xf32>
    %cst_12 = arith.constant dense<0.000000e+00> : vector<256xf32>
    %14 = vector.multi_reduction <add>, %13, %cst_12 [0] : vector<256x256xf32> to vector<256xf32>
    %15 = vector.shape_cast %14 : vector<256xf32> to vector<1x256xf32>
    %16 = arith.addf %12, %15 : vector<1x256xf32>
    %c1_13 = arith.constant 1 : index
    %c0_14 = arith.constant 0 : index
    %17 = vector.load %arg4[%c1_13, %c0_14] : memref<8x256xf32, #tpu.memory_space<vmem>>, vector<1x256xf32>
    tpu.vector_store %arg4[%c1_13, %c0_14], %16 {strides = array<i32>} : memref<8x256xf32, #tpu.memory_space<vmem>>, vector<1x256xf32>,
    return
  }
  func.func @transform_0(%arg0: i32) -> (i32, i32) {
    %c0_i32 = arith.constant 0 : i32
    %c0_i32_0 = arith.constant 0 : i32
    return %arg0, %c0_i32 : i32, i32
  }
  func.func @transform_1(%arg0: i32) -> (i32, i32) {
    %c0_i32 = arith.constant 0 : i32
    %c0_i32_0 = arith.constant 0 : i32
    %c0_i32_1 = arith.constant 0 : i32
    return %c0_i32, %c0_i32_0 : i32, i32
  }
  func.func @transform_2(%arg0: i32) -> (i32, i32) {
    %c0_i32 = arith.constant 0 : i32
    %c0_i32_0 = arith.constant 0 : i32
    return %arg0, %c0_i32 : i32, i32
  }
  func.func @transform_3(%arg0: i32) -> (i32, i32) {
    %c0_i32 = arith.constant 0 : i32
    %c0_i32_0 = arith.constant 0 : i32
    %c0_i32_1 = arith.constant 0 : i32
    return %c0_i32, %c0_i32_0 : i32, i32
  }
}

module attributes {stable_mosaic.version = 11 : i64} {
  func.func @_affine_relu_kernel(%arg0: i32, %arg1: memref<256x128xf32, #tpu.memory_space<vmem>>, %arg2: memref<1x128xf32, #tpu.memory_space<vmem>>, %arg3: memref<1x128xf32, #tpu.memory_space<vmem>>, %arg4: memref<256x128xbf16, #tpu.memory_space<vmem>>) attributes {dimension_semantics = [#tpu.dimension_semantics<parallel>], iteration_bounds = array<i64: 2>, scalar_prefetch = 0 : i64, scratch_operands = 0 : i64, tpu.core_type = #tpu.core_type<tc>, window_params = [{transform_indices = @transform_0, window_bounds = array<i64: 256, 128>}, {pipeline_mode = #tpu.pipeline_mode<synchronous>, transform_indices = @transform_1, window_bounds = array<i64: 1, 128>}, {pipeline_mode = #tpu.pipeline_mode<synchronous>, transform_indices = @transform_2, window_bounds = array<i64: 1, 128>}, {transform_indices = @transform_3, window_bounds = array<i64: 256, 128>}]} {
    %c0 = arith.constant 0 : index
    %c0_0 = arith.constant 0 : index
    %0 = vector.load %arg1[%c0, %c0_0] : memref<256x128xf32, #tpu.memory_space<vmem>>, vector<256x128xf32>
    %c0_1 = arith.constant 0 : index
    %c0_2 = arith.constant 0 : index
    %1 = vector.load %arg2[%c0_1, %c0_2] : memref<1x128xf32, #tpu.memory_space<vmem>>, vector<1x128xf32>
    %2 = vector.broadcast %1 : vector<1x128xf32> to vector<256x128xf32>
    %3 = arith.mulf %0, %2 : vector<256x128xf32>
    %c0_3 = arith.constant 0 : index
    %c0_4 = arith.constant 0 : index
    %4 = vector.load %arg3[%c0_3, %c0_4] : memref<1x128xf32, #tpu.memory_space<vmem>>, vector<1x128xf32>
    %5 = vector.broadcast %4 : vector<1x128xf32> to vector<256x128xf32>
    %6 = arith.addf %3, %5 : vector<256x128xf32>
    %cst = arith.constant 0.000000e+00 : f32
    %7 = vector.broadcast %cst : f32 to vector<256x128xf32>
    %8 = arith.maximumf %6, %7 : vector<256x128xf32>
    %9 = arith.truncf %8 : vector<256x128xf32> to vector<256x128xbf16>
    %c0_5 = arith.constant 0 : index
    %c0_6 = arith.constant 0 : index
    %10 = vector.load %arg4[%c0_5, %c0_6] : memref<256x128xbf16, #tpu.memory_space<vmem>>, vector<256x128xbf16>
    tpu.vector_store %arg4[%c0_5, %c0_6], %9 {strides = array<i32>} : memref<256x128xbf16, #tpu.memory_space<vmem>>, vector<256x128xbf16>,
    return
  }
  func.func @transform_0(%arg0: i32) -> (i32, i32) {
    %c0_i32 = arith.constant 0 : i32
    %c0_i32_0 = arith.constant 0 : i32
    return %arg0, %c0_i32 : i32, i32
  }
  func.func @transform_1(%arg0: i32) -> (i32, i32) {
    %c0_i32 = arith.constant 0 : i32
    %c0_i32_0 = arith.constant 0 : i32
    %c0_i32_1 = arith.constant 0 : i32
    return %c0_i32, %c0_i32_0 : i32, i32
  }
  func.func @transform_2(%arg0: i32) -> (i32, i32) {
    %c0_i32 = arith.constant 0 : i32
    %c0_i32_0 = arith.constant 0 : i32
    %c0_i32_1 = arith.constant 0 : i32
    return %c0_i32, %c0_i32_0 : i32, i32
  }
  func.func @transform_3(%arg0: i32) -> (i32, i32) {
    %c0_i32 = arith.constant 0 : i32
    %c0_i32_0 = arith.constant 0 : i32
    return %arg0, %c0_i32 : i32, i32
  }
}

module attributes {stable_mosaic.version = 11 : i64} {
  func.func @_conv_stats_kernel(%arg0: i32, %arg1: memref<256x128xbf16, #tpu.memory_space<vmem>>, %arg2: memref<128x128xbf16, #tpu.memory_space<vmem>>, %arg3: memref<256x128xf32, #tpu.memory_space<vmem>>, %arg4: memref<8x128xf32, #tpu.memory_space<vmem>>) attributes {dimension_semantics = [#tpu.dimension_semantics<arbitrary>], iteration_bounds = array<i64: 2>, scalar_prefetch = 0 : i64, scratch_operands = 0 : i64, tpu.core_type = #tpu.core_type<tc>, window_params = [{transform_indices = @transform_0, window_bounds = array<i64: 256, 128>}, {pipeline_mode = #tpu.pipeline_mode<synchronous>, transform_indices = @transform_1, window_bounds = array<i64: 128, 128>}, {transform_indices = @transform_2, window_bounds = array<i64: 256, 128>}, {pipeline_mode = #tpu.pipeline_mode<synchronous>, transform_indices = @transform_3, window_bounds = array<i64: 8, 128>}]} {
    %c0 = arith.constant 0 : index
    %c0_0 = arith.constant 0 : index
    %0 = vector.load %arg1[%c0, %c0_0] : memref<256x128xbf16, #tpu.memory_space<vmem>>, vector<256x128xbf16>
    %c0_1 = arith.constant 0 : index
    %c0_2 = arith.constant 0 : index
    %1 = vector.load %arg2[%c0_1, %c0_2] : memref<128x128xbf16, #tpu.memory_space<vmem>>, vector<128x128xbf16>
    %cst = arith.constant dense<0.000000e+00> : vector<256x128xf32>
    %2 = tpu.matmul %0, %1, %cst {dimension_numbers = #tpu.dot_dimension_numbers<[1], [0], [0], [1], [0, 0, 1, 1], [], []>} : vector<256x128xbf16>, vector<128x128xbf16>, vector<256x128xf32> -> vector<256x128xf32>
    %c0_3 = arith.constant 0 : index
    %c0_4 = arith.constant 0 : index
    %3 = vector.load %arg3[%c0_3, %c0_4] : memref<256x128xf32, #tpu.memory_space<vmem>>, vector<256x128xf32>
    tpu.vector_store %arg3[%c0_3, %c0_4], %2 {strides = array<i32>} : memref<256x128xf32, #tpu.memory_space<vmem>>, vector<256x128xf32>,
    %c0_i32 = arith.constant 0 : i32
    %4 = arith.cmpi eq, %arg0, %c0_i32 : i32
    %5 = arith.extui %4 : i1 to i32
    %c0_i32_5 = arith.constant 0 : i32
    %6 = arith.cmpi ne, %5, %c0_i32_5 : i32
    scf.if %6 {
      %cst_15 = arith.constant 0.000000e+00 : f32
      %18 = vector.broadcast %cst_15 : f32 to vector<8x128xf32>
      %c0_16 = arith.constant 0 : index
      %c0_17 = arith.constant 0 : index
      %19 = vector.load %arg4[%c0_16, %c0_17] : memref<8x128xf32, #tpu.memory_space<vmem>>, vector<8x128xf32>
      tpu.vector_store %arg4[%c0_16, %c0_17], %18 {strides = array<i32>} : memref<8x128xf32, #tpu.memory_space<vmem>>, vector<8x128xf32>,
    } else {
    }
    %c0_6 = arith.constant 0 : index
    %c0_7 = arith.constant 0 : index
    %7 = vector.load %arg4[%c0_6, %c0_7] : memref<8x128xf32, #tpu.memory_space<vmem>>, vector<1x128xf32>
    %cst_8 = arith.constant dense<0.000000e+00> : vector<128xf32>
    %8 = vector.multi_reduction <add>, %2, %cst_8 [0] : vector<256x128xf32> to vector<128xf32>
    %9 = vector.shape_cast %8 : vector<128xf32> to vector<1x128xf32>
    %10 = arith.addf %7, %9 : vector<1x128xf32>
    %c0_9 = arith.constant 0 : index
    %c0_10 = arith.constant 0 : index
    %11 = vector.load %arg4[%c0_9, %c0_10] : memref<8x128xf32, #tpu.memory_space<vmem>>, vector<1x128xf32>
    tpu.vector_store %arg4[%c0_9, %c0_10], %10 {strides = array<i32>} : memref<8x128xf32, #tpu.memory_space<vmem>>, vector<1x128xf32>,
    %c1 = arith.constant 1 : index
    %c0_11 = arith.constant 0 : index
    %12 = vector.load %arg4[%c1, %c0_11] : memref<8x128xf32, #tpu.memory_space<vmem>>, vector<1x128xf32>
    %13 = arith.mulf %2, %2 : vector<256x128xf32>
    %cst_12 = arith.constant dense<0.000000e+00> : vector<128xf32>
    %14 = vector.multi_reduction <add>, %13, %cst_12 [0] : vector<256x128xf32> to vector<128xf32>
    %15 = vector.shape_cast %14 : vector<128xf32> to vector<1x128xf32>
    %16 = arith.addf %12, %15 : vector<1x128xf32>
    %c1_13 = arith.constant 1 : index
    %c0_14 = arith.constant 0 : index
    %17 = vector.load %arg4[%c1_13, %c0_14] : memref<8x128xf32, #tpu.memory_space<vmem>>, vector<1x128xf32>
    tpu.vector_store %arg4[%c1_13, %c0_14], %16 {strides = array<i32>} : memref<8x128xf32, #tpu.memory_space<vmem>>, vector<1x128xf32>,
    return
  }
  func.func @transform_0(%arg0: i32) -> (i32, i32) {
    %c0_i32 = arith.constant 0 : i32
    %c0_i32_0 = arith.constant 0 : i32
    return %arg0, %c0_i32 : i32, i32
  }
  func.func @transform_1(%arg0: i32) -> (i32, i32) {
    %c0_i32 = arith.constant 0 : i32
    %c0_i32_0 = arith.constant 0 : i32
    %c0_i32_1 = arith.constant 0 : i32
    return %c0_i32, %c0_i32_0 : i32, i32
  }
  func.func @transform_2(%arg0: i32) -> (i32, i32) {
    %c0_i32 = arith.constant 0 : i32
    %c0_i32_0 = arith.constant 0 : i32
    return %arg0, %c0_i32 : i32, i32
  }
  func.func @transform_3(%arg0: i32) -> (i32, i32) {
    %c0_i32 = arith.constant 0 : i32
    %c0_i32_0 = arith.constant 0 : i32
    %c0_i32_1 = arith.constant 0 : i32
    return %c0_i32, %c0_i32_0 : i32, i32
  }
}

module attributes {stable_mosaic.version = 11 : i64} {
  func.func @_affine_skip_add_relu_kernel(%arg0: i32, %arg1: memref<256x128xf32, #tpu.memory_space<vmem>>, %arg2: memref<1x128xf32, #tpu.memory_space<vmem>>, %arg3: memref<1x128xf32, #tpu.memory_space<vmem>>, %arg4: memref<256x128xf32, #tpu.memory_space<vmem>>, %arg5: memref<1x128xf32, #tpu.memory_space<vmem>>, %arg6: memref<1x128xf32, #tpu.memory_space<vmem>>, %arg7: memref<256x128xf32, #tpu.memory_space<vmem>>) attributes {dimension_semantics = [#tpu.dimension_semantics<parallel>], iteration_bounds = array<i64: 2>, scalar_prefetch = 0 : i64, scratch_operands = 0 : i64, tpu.core_type = #tpu.core_type<tc>, window_params = [{transform_indices = @transform_0, window_bounds = array<i64: 256, 128>}, {pipeline_mode = #tpu.pipeline_mode<synchronous>, transform_indices = @transform_1, window_bounds = array<i64: 1, 128>}, {pipeline_mode = #tpu.pipeline_mode<synchronous>, transform_indices = @transform_2, window_bounds = array<i64: 1, 128>}, {transform_indices = @transform_3, window_bounds = array<i64: 256, 128>}, {pipeline_mode = #tpu.pipeline_mode<synchronous>, transform_indices = @transform_4, window_bounds = array<i64: 1, 128>}, {pipeline_mode = #tpu.pipeline_mode<synchronous>, transform_indices = @transform_5, window_bounds = array<i64: 1, 128>}, {transform_indices = @transform_6, window_bounds = array<i64: 256, 128>}]} {
    %c0 = arith.constant 0 : index
    %c0_0 = arith.constant 0 : index
    %0 = vector.load %arg1[%c0, %c0_0] : memref<256x128xf32, #tpu.memory_space<vmem>>, vector<256x128xf32>
    %c0_1 = arith.constant 0 : index
    %c0_2 = arith.constant 0 : index
    %1 = vector.load %arg2[%c0_1, %c0_2] : memref<1x128xf32, #tpu.memory_space<vmem>>, vector<1x128xf32>
    %2 = vector.broadcast %1 : vector<1x128xf32> to vector<256x128xf32>
    %3 = arith.mulf %0, %2 : vector<256x128xf32>
    %c0_3 = arith.constant 0 : index
    %c0_4 = arith.constant 0 : index
    %4 = vector.load %arg3[%c0_3, %c0_4] : memref<1x128xf32, #tpu.memory_space<vmem>>, vector<1x128xf32>
    %5 = vector.broadcast %4 : vector<1x128xf32> to vector<256x128xf32>
    %6 = arith.addf %3, %5 : vector<256x128xf32>
    %c0_5 = arith.constant 0 : index
    %c0_6 = arith.constant 0 : index
    %7 = vector.load %arg4[%c0_5, %c0_6] : memref<256x128xf32, #tpu.memory_space<vmem>>, vector<256x128xf32>
    %c0_7 = arith.constant 0 : index
    %c0_8 = arith.constant 0 : index
    %8 = vector.load %arg5[%c0_7, %c0_8] : memref<1x128xf32, #tpu.memory_space<vmem>>, vector<1x128xf32>
    %9 = vector.broadcast %8 : vector<1x128xf32> to vector<256x128xf32>
    %10 = arith.mulf %7, %9 : vector<256x128xf32>
    %c0_9 = arith.constant 0 : index
    %c0_10 = arith.constant 0 : index
    %11 = vector.load %arg6[%c0_9, %c0_10] : memref<1x128xf32, #tpu.memory_space<vmem>>, vector<1x128xf32>
    %12 = vector.broadcast %11 : vector<1x128xf32> to vector<256x128xf32>
    %13 = arith.addf %10, %12 : vector<256x128xf32>
    %14 = arith.addf %6, %13 : vector<256x128xf32>
    %cst = arith.constant 0.000000e+00 : f32
    %15 = vector.broadcast %cst : f32 to vector<256x128xf32>
    %16 = arith.maximumf %14, %15 : vector<256x128xf32>
    %c0_11 = arith.constant 0 : index
    %c0_12 = arith.constant 0 : index
    %17 = vector.load %arg7[%c0_11, %c0_12] : memref<256x128xf32, #tpu.memory_space<vmem>>, vector<256x128xf32>
    tpu.vector_store %arg7[%c0_11, %c0_12], %16 {strides = array<i32>} : memref<256x128xf32, #tpu.memory_space<vmem>>, vector<256x128xf32>,
    return
  }
  func.func @transform_0(%arg0: i32) -> (i32, i32) {
    %c0_i32 = arith.constant 0 : i32
    %c0_i32_0 = arith.constant 0 : i32
    return %arg0, %c0_i32 : i32, i32
  }
  func.func @transform_1(%arg0: i32) -> (i32, i32) {
    %c0_i32 = arith.constant 0 : i32
    %c0_i32_0 = arith.constant 0 : i32
    %c0_i32_1 = arith.constant 0 : i32
    return %c0_i32, %c0_i32_0 : i32, i32
  }
  func.func @transform_2(%arg0: i32) -> (i32, i32) {
    %c0_i32 = arith.constant 0 : i32
    %c0_i32_0 = arith.constant 0 : i32
    %c0_i32_1 = arith.constant 0 : i32
    return %c0_i32, %c0_i32_0 : i32, i32
  }
  func.func @transform_3(%arg0: i32) -> (i32, i32) {
    %c1_i32 = arith.constant 1 : i32
    %c0_i32 = arith.constant 0 : i32
    return %arg0, %c1_i32 : i32, i32
  }
  func.func @transform_4(%arg0: i32) -> (i32, i32) {
    %c0_i32 = arith.constant 0 : i32
    %c0_i32_0 = arith.constant 0 : i32
    %c0_i32_1 = arith.constant 0 : i32
    return %c0_i32, %c0_i32_0 : i32, i32
  }
  func.func @transform_5(%arg0: i32) -> (i32, i32) {
    %c0_i32 = arith.constant 0 : i32
    %c0_i32_0 = arith.constant 0 : i32
    %c0_i32_1 = arith.constant 0 : i32
    return %c0_i32, %c0_i32_0 : i32, i32
  }
  func.func @transform_6(%arg0: i32) -> (i32, i32) {
    %c0_i32 = arith.constant 0 : i32
    %c0_i32_0 = arith.constant 0 : i32
    return %arg0, %c0_i32 : i32, i32
  }
}

</mosaic_0001>

<bundles_post_ra>
// kernel: channel_compression_forward.5
= control target key start
LH: loop header
LB: loop body
LE: loop exit
PB: predicated region body
PF: predicated region fallthrough
CT: control target
= control target key end

     0   :  { %s942_s12 = smov 0   ;;  %s944_s13 = smov 0   ;;  %s1191_s0 = inlined_call_operand.vmem [shape: f32[512,256], index: 0, kind: input, shape index: {}]   ;;  %s1192_s1 = inlined_call_operand.vmem [shape: f32[1,128], index: 1, kind: input, shape index: {}]   ;;  %s1193_s2 = inlined_call_operand.vmem [shape: f32[1,128], index: 2, kind: input, shape index: {}]   ;;  %s1194_s3 = inlined_call_operand.vmem [shape: bf16[512,128], index: 3, kind: output, shape index: {}]  }
   0x1   :  { %s946_s14 = smov 0  }
   0x2 LB: > { %s697_s15 = sadd.s32 4294967295, %s920_s14   ;;  %s959_s16 = sadd.s32 1, %s920_s14   ;;  %s920_s14 = sphi %s946_s14, %s1197_s14   ;;  %s916_s13 = sphi %s944_s13, %s1196_s13   ;;  %s912_s12 = sphi %s942_s12, %s1195_s12  }
   0x3   : > { %s17_s17 = ssub.s32 %s920_s14, %s959_s16  ;;  %s20_s18 = sadd.s32 1, %s916_s13 }
   0x4   : > { %p18_p0 = scmp.eq.s32.totalorder %s17_s17, 0  ;;  %p27_p1 = scmp.ne.s32.totalorder %s916_s13, %s912_s12 }
   0x5   : > { %p28_p2 = scmp.eq.s32.totalorder %s920_s14, 0  ;;  %p700_p4 = scmp.ge.s32.totalorder %s920_s14, 2 }
   0x6   : > { %s968_s19 = scalar_select %p18_p0, %s916_s13, %s20_s18  }
   0x7   : > { %p29_p3 = por %p28_p2, %p27_p1  ;;  %127 = sbr.rel (%p700_p4) target bundleno = 34 (0x22), region = 24 }
   0xe   : > { %130 = sbr.rel (!%p29_p3) target bundleno = 34 (0x22), region = 28  ;;  %s132_s20 = sand.u32 (%p29_p3), 1, %s916_s13  }
   0xf   : > { %s746_s21 = sshll.u32 (%p29_p3), %s920_s14, 9  ;;  %s701_s22 = sshll.u32 (%p29_p3), %s132_s20, 8 }
  0x10   : > { %s976_s25 = scalar_lea.vmem (%p29_p3), %s1191_s0, %s746_s21  ;;  %s981_s26 = scalar_lea.vmem (%p29_p3), [#allocation2], %s701_s22 }
  0x11   : > { %v228_v0 = vld [vmem:[%s976_s25] sm:$0xff] (%p29_p3)  ;;  %v230_v1 = vld [vmem:[%s976_s25 + $0x10] sm:$0xff] (%p29_p3) }
  0x12   : > { %v232_v2 = vld [vmem:[%s976_s25 + $0x20] sm:$0xff] (%p29_p3)  ;;  %229 = vst [vmem:[%s981_s26] sm:$0xff] (%p29_p3), %v228_v0  ;;  %231 = vst [vmem:[%s981_s26 + $0x8] sm:$0xff] (%p29_p3), %v230_v1  ;;  %v234_v3 = vld [vmem:[%s976_s25 + $0x30] sm:$0xff] (%p29_p3) }
  0x13   : > { %233 = vst [vmem:[%s981_s26 + $0x10] sm:$0xff] (%p29_p3), %v232_v2  ;;  %v236_v4 = vld [vmem:[%s976_s25 + $0x40] sm:$0xff] (%p29_p3)  ;;  %v238_v5 = vld [vmem:[%s976_s25 + $0x50] sm:$0xff] (%p29_p3)  ;;  %235 = vst [vmem:[%s981_s26 + $0x18] sm:$0xff] (%p29_p3), %v234_v3 }
  0x14   : > { %237 = vst [vmem:[%s981_s26 + $0x20] sm:$0xff] (%p29_p3), %v236_v4  ;;  %239 = vst [vmem:[%s981_s26 + $0x28] sm:$0xff] (%p29_p3), %v238_v5  ;;  %v240_v6 = vld [vmem:[%s976_s25 + $0x60] sm:$0xff] (%p29_p3)  ;;  %v242_v7 = vld [vmem:[%s976_s25 + $0x70] sm:$0xff] (%p29_p3) }
  0x15   : > { %v244_v8 = vld [vmem:[%s976_s25 + $0x80] sm:$0xff]  ;;  %241 = vst [vmem:[%s981_s26 + $0x30] sm:$0xff] %v240_v6  ;;  %243 = vst [vmem:[%s981_s26 + $0x38] sm:$0xff] %v242_v7  ;;  %v246_v9 = vld [vmem:[%s976_s25 + $0x90] sm:$0xff] }
  0x16   : > { %245 = vst [vmem:[%s981_s26 + $0x40] sm:$0xff] %v244_v8  ;;  %v248_v10 = vld [vmem:[%s976_s25 + $0xa0] sm:$0xff]  ;;  %v250_v11 = vld [vmem:[%s976_s25 + $0xb0] sm:$0xff]  ;;  %247 = vst [vmem:[%s981_s26 + $0x48] sm:$0xff] %v246_v9 }
  0x17   : > { %249 = vst [vmem:[%s981_s26 + $0x50] sm:$0xff] %v248_v10  ;;  %251 = vst [vmem:[%s981_s26 + $0x58] sm:$0xff] %v250_v11  ;;  %v252_v12 = vld [vmem:[%s976_s25 + $0xc0] sm:$0xff]  ;;  %v254_v13 = vld [vmem:[%s976_s25 + $0xd0] sm:$0xff] }
  0x18   : > { %v256_v14 = vld [vmem:[%s976_s25 + $0xe0] sm:$0xff]  ;;  %253 = vst [vmem:[%s981_s26 + $0x60] sm:$0xff] %v252_v12  ;;  %255 = vst [vmem:[%s981_s26 + $0x68] sm:$0xff] %v254_v13  ;;  %v258_v15 = vld [vmem:[%s976_s25 + $0xf0] sm:$0xff] }
  0x19   : > { %257 = vst [vmem:[%s981_s26 + $0x70] sm:$0xff] %v256_v14  ;;  %v260_v16 = vld [vmem:[%s976_s25 + $0x100] sm:$0xff]  ;;  %v262_v17 = vld [vmem:[%s976_s25 + $0x110] sm:$0xff]  ;;  %259 = vst [vmem:[%s981_s26 + $0x78] sm:$0xff] %v258_v15 }
  0x1a   : > { %261 = vst [vmem:[%s981_s26 + $0x80] sm:$0xff] %v260_v16  ;;  %263 = vst [vmem:[%s981_s26 + $0x88] sm:$0xff] %v262_v17  ;;  %v264_v18 = vld [vmem:[%s976_s25 + $0x120] sm:$0xff]  ;;  %v266_v19 = vld [vmem:[%s976_s25 + $0x130] sm:$0xff] }
  0x1b   : > { %v268_v20 = vld [vmem:[%s976_s25 + $0x140] sm:$0xff]  ;;  %265 = vst [vmem:[%s981_s26 + $0x90] sm:$0xff] %v264_v18  ;;  %267 = vst [vmem:[%s981_s26 + $0x98] sm:$0xff] %v266_v19  ;;  %v270_v21 = vld [vmem:[%s976_s25 + $0x150] sm:$0xff] }
  0x1c   : > { %269 = vst [vmem:[%s981_s26 + $0xa0] sm:$0xff] %v268_v20  ;;  %v272_v22 = vld [vmem:[%s976_s25 + $0x160] sm:$0xff]  ;;  %v274_v23 = vld [vmem:[%s976_s25 + $0x170] sm:$0xff]  ;;  %271 = vst [vmem:[%s981_s26 + $0xa8] sm:$0xff] %v270_v21 }
  0x1d   : > { %273 = vst [vmem:[%s981_s26 + $0xb0] sm:$0xff] %v272_v22  ;;  %275 = vst [vmem:[%s981_s26 + $0xb8] sm:$0xff] %v274_v23  ;;  %v276_v24 = vld [vmem:[%s976_s25 + $0x180] sm:$0xff]  ;;  %v278_v25 = vld [vmem:[%s976_s25 + $0x190] sm:$0xff] }
  0x1e   : > { %v280_v26 = vld [vmem:[%s976_s25 + $0x1a0] sm:$0xff]  ;;  %277 = vst [vmem:[%s981_s26 + $0xc0] sm:$0xff] %v276_v24  ;;  %279 = vst [vmem:[%s981_s26 + $0xc8] sm:$0xff] %v278_v25  ;;  %v282_v27 = vld [vmem:[%s976_s25 + $0x1b0] sm:$0xff] }
  0x1f   : > { %281 = vst [vmem:[%s981_s26 + $0xd0] sm:$0xff] %v280_v26  ;;  %v284_v28 = vld [vmem:[%s976_s25 + $0x1c0] sm:$0xff]  ;;  %v286_v29 = vld [vmem:[%s976_s25 + $0x1d0] sm:$0xff]  ;;  %283 = vst [vmem:[%s981_s26 + $0xd8] sm:$0xff] %v282_v27 }
  0x20   : > { %285 = vst [vmem:[%s981_s26 + $0xe0] sm:$0xff] %v284_v28  ;;  %287 = vst [vmem:[%s981_s26 + $0xe8] sm:$0xff] %v286_v29  ;;  %v288_v30 = vld [vmem:[%s976_s25 + $0x1e0] sm:$0xff]  ;;  %v290_v31 = vld [vmem:[%s976_s25 + $0x1f0] sm:$0xff] }
  0x21   : > { %289 = vst [vmem:[%s981_s26 + $0xf0] sm:$0xff] %v288_v30  ;;  %291 = vst [vmem:[%s981_s26 + $0xf8] sm:$0xff] %v290_v31 }
  0x22 PF: > { %p705_p5 = scmp.ge.s32.totalorder %s920_s14, 1  ;;  %p296_p6 = scmp.lt.s32.totalorder %s920_s14, 3 }
  0x24   : > { %p297_p7 = pnand %p705_p5, %p296_p6 }
  0x25   : > { %s303_s27 = sand.u32 (!%p297_p7), 1, %s912_s12   ;;  %s707_s28 = sshll.u32 (!%p297_p7), %s697_s15, 5  ;;  %v1052_v32 = vld [vmem:[%s1192_s1] ss:$0 sm:$0xff] (!%p297_p7) }
  0x26   : > { %300 = sbr.rel (%p297_p7) target bundleno = 75 (0x4b), region = 66  ;;  %s706_s29 = sshll.u32 (!%p297_p7), %s303_s27, 8  ;;  %v1057_v33 = vld [vmem:[%s1193_s2] ss:$0 sm:$0xff] (!%p297_p7) }
  0x27   : > { %p328_p8 = scmp.lt.s32.totalorder (!%p297_p7), %s707_s28, 63  ;;  %s1061_s7 = scalar_lea.vmem (!%p297_p7), [#allocation2], %s706_s29 }
  0x28   : > { %v333_v34 = vld [vmem:[%s1061_s7] sm:$0xff] (!%p297_p7)  ;;  %v334_v35 = vld [vmem:[%s1061_s7 + $0x8] sm:$0xff] (!%p297_p7)  ;;  %v335_v36 = vld [vmem:[%s1061_s7 + $0x10] sm:$0xff] (!%p297_p7) }
  0x29   : > { %v372_v37 = vmul.f32 (!%p297_p7), %v1052_v32, %v333_v34  ;;  %v373_v38 = vmul.f32 (!%p297_p7), %v1052_v32, %v334_v35  ;;  %v336_v39 = vld [vmem:[%s1061_s7 + $0x18] sm:$0xff] (!%p297_p7)  ;;  %v374_v40 = vmul.f32 (!%p297_p7), %v1052_v32, %v335_v36  ;;  %v337_v41 = vld [vmem:[%s1061_s7 + $0x20] sm:$0xff] (!%p297_p7)  ;;  %v338_v42 = vld [vmem:[%s1061_s7 + $0x28] sm:$0xff] (!%p297_p7) }
  0x2a   : > { %v375_v43 = vmul.f32 (!%p297_p7), %v1052_v32, %v336_v39  ;;  %v376_v44 = vmul.f32 (!%p297_p7), %v1052_v32, %v337_v41  ;;  %v377_v45 = vmul.f32 (!%p297_p7), %v1052_v32, %v338_v42  ;;  %v339_v46 = vld [vmem:[%s1061_s7 + $0x30] sm:$0xff] (!%p297_p7)  ;;  %v340_v47 = vld [vmem:[%s1061_s7 + $0x38] sm:$0xff] (!%p297_p7)  ;;  %v341_v56 = vld [vmem:[%s1061_s7 + $0x40] sm:$0xff] (!%p297_p7) }
  0x2b   : > { %v411_v48 = vadd.f32 (!%p297_p7), %v1057_v33, %v372_v37  ;;  %v412_v49 = vadd.f32 (!%p297_p7), %v1057_v33, %v373_v38  ;;  %v413_v50 = vadd.f32 (!%p297_p7), %v1057_v33, %v374_v40  ;;  %v378_v51 = vmul.f32 (!%p297_p7), %v1052_v32, %v339_v46  ;;  %v342_v57 = vld [vmem:[%s1061_s7 + $0x48] sm:$0xff] (!%p297_p7)  ;;  %v343_v62 = vld [vmem:[%s1061_s7 + $0x50] sm:$0xff] (!%p297_p7)  ;;  %v344_v3 = vld [vmem:[%s1061_s7 + $0x58] sm:$0xff] (!%p297_p7) }
  0x2c   : > { %v414_v52 = vadd.f32 (!%p297_p7), %v1057_v33, %v375_v43  ;;  %v415_v53 = vadd.f32 (!%p297_p7), %v1057_v33, %v376_v44  ;;  %v416_v54 = vadd.f32 (!%p297_p7), %v1057_v33, %v377_v45  ;;  %v379_v55 = vmul.f32 (!%p297_p7), %v1052_v32, %v340_v47  ;;  %v345_v4 = vld [vmem:[%s1061_s7 + $0x60] sm:$0xff] (!%p297_p7)  ;;  %v346_v9 = vld [vmem:[%s1061_s7 + $0x68] sm:$0xff] (!%p297_p7)  ;;  %v347_v10 = vld [vmem:[%s1061_s7 + $0x70] sm:$0xff] (!%p297_p7) }
  0x2d   : > { %s1199_s28 = smov (!%p328_p8, %s707_s28), 63  ;;  %v443_v58 = vmax.f32 %v411_v48, 0.0  ;;  %v444_v59 = vmax.f32 %v412_v49, 0.0  ;;  %v445_v60 = vmax.f32 %v413_v50, 0.0  ;;  %v417_v61 = vadd.f32 %v1057_v33, %v378_v51  ;;  %v348_v19 = vld [vmem:[%s1061_s7 + $0x78] sm:$0xff]  ;;  %v349_v24 = vld [vmem:[%s1061_s7 + $0x80] sm:$0xff] }
  0x2e   : > { %s708_s8 = sshll.u32 %s1199_s28, 2  ;;  %v446_v63 = vmax.f32 %v414_v52, 0.0  ;;  %v447_v0 = vmax.f32 %v415_v53, 0.0  ;;  %v448_v1 = vmax.f32 %v416_v54, 0.0  ;;  %v418_v2 = vadd.f32 %v1057_v33, %v379_v55  ;;  %v350_v29 = vld [vmem:[%s1061_s7 + $0x88] sm:$0xff]  ;;  %v351_v36 = vld [vmem:[%s1061_s7 + $0x90] sm:$0xff] }
  0x2f   : > { %s1093_s11 = scalar_lea.vmem %s1194_s3, %s708_s8  ;;  %v782_v5 = vpack.c.bf16 %v444_v59, %v443_v58  ;;  %v449_v6 = vmax.f32 %v417_v61, 0.0  ;;  %v380_v7 = vmul.f32 %v1052_v32, %v341_v56  ;;  %v381_v8 = vmul.f32 %v1052_v32, %v342_v57  ;;  %v352_v37 = vld [vmem:[%s1061_s7 + $0x98] sm:$0xff]  ;;  %v353_v42 = vld [vmem:[%s1061_s7 + $0xa0] sm:$0xff]  ;;  %v354_v47 = vld [vmem:[%s1061_s7 + $0xa8] sm:$0xff] }
  0x30   : > { %v787_v11 = vpack.c.bf16 %v446_v63, %v445_v60  ;;  %v792_v12 = vpack.c.bf16 %v448_v1, %v447_v0  ;;  %v450_v13 = vmax.f32 %v418_v2, 0.0  ;;  %v382_v14 = vmul.f32 %v1052_v32, %v343_v62  ;;  %v355_v52 = vld [vmem:[%s1061_s7 + $0xb0] sm:$0xff]  ;;  %v356_v57 = vld [vmem:[%s1061_s7 + $0xb8] sm:$0xff]  ;;  %v357_v62 = vld [vmem:[%s1061_s7 + $0xc0] sm:$0xff] }
  0x31   : > { %783 = vst [vmem:[%s1093_s11] sm:$0xff] %v782_v5   ;;  %v419_v15 = vadd.f32 %v1057_v33, %v380_v7  ;;  %v420_v16 = vadd.f32 %v1057_v33, %v381_v8  ;;  %v383_v17 = vmul.f32 %v1052_v32, %v344_v3  ;;  %v384_v18 = vmul.f32 %v1052_v32, %v345_v4  ;;  %v358_v3 = vld [vmem:[%s1061_s7 + $0xc8] sm:$0xff]  ;;  %v359_v8 = vld [vmem:[%s1061_s7 + $0xd0] sm:$0xff] }
  0x32   : > { %859 = vst [vmem:[%s1093_s11 + $0x8] sm:$0xff] %v787_v11   ;;  %860 = vst [vmem:[%s1093_s11 + $0x10] sm:$0xff] %v792_v12   ;;  %v797_v20 = vpack.c.bf16 %v450_v13, %v449_v6  ;;  %v421_v21 = vadd.f32 %v1057_v33, %v382_v14  ;;  %v385_v22 = vmul.f32 %v1052_v32, %v346_v9  ;;  %v360_v9 = vld [vmem:[%s1061_s7 + $0xd8] sm:$0xff]  ;;  %v361_v14 = vld [vmem:[%s1061_s7 + $0xe0] sm:$0xff] }
  0x33   : > { %v386_v23 = vmul.f32 %v1052_v32, %v347_v10  ;;  %v451_v25 = vmax.f32 %v419_v15, 0.0  ;;  %v452_v26 = vmax.f32 %v420_v16, 0.0  ;;  %v422_v27 = vadd.f32 %v1057_v33, %v383_v17 }
  0x34   : > { %v423_v28 = vadd.f32 %v1057_v33, %v384_v18  ;;  %861 = vst [vmem:[%s1093_s11 + $0x18] sm:$0xff] %v797_v20   ;;  %v453_v30 = vmax.f32 %v421_v21, 0.0  ;;  %v424_v31 = vadd.f32 %v1057_v33, %v385_v22  ;;  %v387_v34 = vmul.f32 %v1052_v32, %v348_v19  ;;  %v362_v19 = vld [vmem:[%s1061_s7 + $0xe8] sm:$0xff] }
  0x35   : > { %v425_v35 = vadd.f32 %v1057_v33, %v386_v23  ;;  %v802_v38 = vpack.c.bf16 %v452_v26, %v451_v25  ;;  %v454_v39 = vmax.f32 %v422_v27, 0.0  ;;  %v388_v41 = vmul.f32 %v1052_v32, %v349_v24  ;;  %v363_v24 = vld [vmem:[%s1061_s7 + $0xf0] sm:$0xff] }
  0x36   : > { %v455_v40 = vmax.f32 %v423_v28, 0.0  ;;  %v456_v43 = vmax.f32 %v424_v31, 0.0  ;;  %v426_v44 = vadd.f32 %v1057_v33, %v387_v34  ;;  %v389_v46 = vmul.f32 %v1052_v32, %v350_v29  ;;  %v364_v29 = vld [vmem:[%s1061_s7 + $0xf8] sm:$0xff] }
  0x37   : > { %v457_v45 = vmax.f32 %v425_v35, 0.0  ;;  %862 = vst [vmem:[%s1093_s11 + $0x20] sm:$0xff] %v802_v38   ;;  %v807_v48 = vpack.c.bf16 %v454_v39, %v453_v30  ;;  %v427_v49 = vadd.f32 %v1057_v33, %v388_v41  ;;  %v390_v50 = vmul.f32 %v1052_v32, %v351_v36 }
  0x38   : > { %v391_v51 = vmul.f32 %v1052_v32, %v352_v37  ;;  %v812_v53 = vpack.c.bf16 %v456_v43, %v455_v40  ;;  %v458_v54 = vmax.f32 %v426_v44, 0.0  ;;  %v428_v55 = vadd.f32 %v1057_v33, %v389_v46 }
  0x39   : > { %v392_v56 = vmul.f32 %v1052_v32, %v353_v42  ;;  %863 = vst [vmem:[%s1093_s11 + $0x28] sm:$0xff] %v807_v48   ;;  %v459_v58 = vmax.f32 %v427_v49, 0.0  ;;  %v429_v59 = vadd.f32 %v1057_v33, %v390_v50  ;;  %v393_v61 = vmul.f32 %v1052_v32, %v354_v47 }
  0x3a   : > { %v430_v60 = vadd.f32 %v1057_v33, %v391_v51  ;;  %864 = vst [vmem:[%s1093_s11 + $0x30] sm:$0xff] %v812_v53   ;;  %v817_v63 = vpack.c.bf16 %v458_v54, %v457_v45  ;;  %v460_v0 = vmax.f32 %v428_v55, 0.0  ;;  %v394_v2 = vmul.f32 %v1052_v32, %v355_v52 }
  0x3b   : > { %v431_v1 = vadd.f32 %v1057_v33, %v392_v56  ;;  %v461_v4 = vmax.f32 %v429_v59, 0.0  ;;  %v432_v6 = vadd.f32 %v1057_v33, %v393_v61  ;;  %v395_v7 = vmul.f32 %v1052_v32, %v356_v57 }
  0x3c   : > { %v462_v5 = vmax.f32 %v430_v60, 0.0  ;;  %865 = vst [vmem:[%s1093_s11 + $0x38] sm:$0xff] %v817_v63   ;;  %v822_v10 = vpack.c.bf16 %v460_v0, %v459_v58  ;;  %v433_v12 = vadd.f32 %v1057_v33, %v394_v2  ;;  %v396_v13 = vmul.f32 %v1052_v32, %v357_v62 }
  0x3d   : > { %v463_v11 = vmax.f32 %v431_v1, 0.0  ;;  %v464_v16 = vmax.f32 %v432_v6, 0.0  ;;  %v434_v17 = vadd.f32 %v1057_v33, %v395_v7  ;;  %v397_v18 = vmul.f32 %v1052_v32, %v358_v3 }
  0x3e   : > { %v827_v15 = vpack.c.bf16 %v462_v5, %v461_v4  ;;  %866 = vst [vmem:[%s1093_s11 + $0x40] sm:$0xff] %v822_v10   ;;  %v465_v20 = vmax.f32 %v433_v12, 0.0  ;;  %v435_v21 = vadd.f32 %v1057_v33, %v396_v13  ;;  %v398_v22 = vmul.f32 %v1052_v32, %v359_v8 }
  0x3f   : > { %v399_v23 = vmul.f32 %v1052_v32, %v360_v9  ;;  %v832_v25 = vpack.c.bf16 %v464_v16, %v463_v11  ;;  %v466_v26 = vmax.f32 %v434_v17, 0.0  ;;  %v436_v27 = vadd.f32 %v1057_v33, %v397_v18 }
  0x40   : > { %867 = vst [vmem:[%s1093_s11 + $0x48] sm:$0xff] %v827_v15   ;;  %v400_v28 = vmul.f32 %v1052_v32, %v361_v14  ;;  %v467_v30 = vmax.f32 %v435_v21, 0.0  ;;  %v437_v31 = vadd.f32 %v1057_v33, %v398_v22  ;;  %v401_v35 = vmul.f32 %v1052_v32, %v362_v19 }
  0x41   : > { %v438_v34 = vadd.f32 %v1057_v33, %v399_v23  ;;  %868 = vst [vmem:[%s1093_s11 + $0x50] sm:$0xff] %v832_v25   ;;  %v837_v36 = vpack.c.bf16 %v466_v26, %v465_v20  ;;  %v468_v37 = vmax.f32 %v436_v27, 0.0  ;;  %v402_v39 = vmul.f32 %v1052_v32, %v363_v24 }
  0x42   : > { %v439_v38 = vadd.f32 %v1057_v33, %v400_v28  ;;  %v469_v40 = vmax.f32 %v437_v31, 0.0  ;;  %v440_v42 = vadd.f32 %v1057_v33, %v401_v35  ;;  %v403_v43 = vmul.f32 %v1052_v32, %v364_v29 }
  0x43   : > { %v470_v41 = vmax.f32 %v438_v34, 0.0  ;;  %869 = vst [vmem:[%s1093_s11 + $0x58] sm:$0xff] %v837_v36   ;;  %v842_v44 = vpack.c.bf16 %v468_v37, %v467_v30  ;;  %v441_v46 = vadd.f32 %v1057_v33, %v402_v39 }
  0x44   : > { %v471_v45 = vmax.f32 %v439_v38, 0.0  ;;  %v472_v48 = vmax.f32 %v440_v42, 0.0  ;;  %v442_v49 = vadd.f32 %v1057_v33, %v403_v43 }
  0x45   : > { %v847_v47 = vpack.c.bf16 %v470_v41, %v469_v40  ;;  %870 = vst [vmem:[%s1093_s11 + $0x60] sm:$0xff] %v842_v44   ;;  %v473_v50 = vmax.f32 %v441_v46, 0.0 }
  0x46   : > { %v852_v51 = vpack.c.bf16 %v472_v48, %v471_v45  ;;  %v474_v52 = vmax.f32 %v442_v49, 0.0 }
  0x47   : > { %871 = vst [vmem:[%s1093_s11 + $0x68] sm:$0xff] %v847_v47  }
  0x48   : > { %872 = vst [vmem:[%s1093_s11 + $0x70] sm:$0xff] %v852_v51   ;;  %v857_v53 = vpack.c.bf16 %v474_v52, %v473_v50 }
  0x4a   : > { %873 = vst [vmem:[%s1093_s11 + $0x78] sm:$0xff] %v857_v53  }
  0x4b PF: > { %p10_p9 = scmp.ge.s32.totalorder %s959_s16, 4   ;;  %s1195_s12 = smov %s916_s13 }
  0x4c   : > { %s1196_s13 = smov %s968_s19  ;;  %s1197_s14 = smov %s959_s16 }
  0x4d   :  { %12 = sbr.rel (!%p10_p9) target bundleno = 2 (0x2), region = 105 }

// kernel: channel_compression_forward.4
= control target key start
LH: loop header
LB: loop body
LE: loop exit
PB: predicated region body
PF: predicated region fallthrough
CT: control target
= control target key end

     0   :  { %s1133_s12 = smov 0   ;;  %s1716_s0 = inlined_call_operand.vmem [shape: bf16[512,128], index: 0, kind: input, shape index: {}]   ;;  %s1717_s1 = inlined_call_operand.vmem [shape: bf16[128,256], index: 1, kind: input, shape index: {}]   ;;  %s1718_s2 = inlined_call_operand.vmem [shape: f32[512,256], index: 2, kind: output, shape index: {0}]   ;;  %s1719_s3 = inlined_call_operand.vmem [shape: f32[8,256], index: 3, kind: output, shape index: {1}]  }
   0x1 LB: > { %s987_s13 = sadd.s32 4294967295, %s1108_s12   ;;  %p991_p0 = scmp.ge.s32.totalorder %s1108_s12, 1  ;;  %s1108_s12 = sphi %s1133_s12, %s14_s12  }
   0x2   : > { %p136_p1 = scmp.lt.s32.totalorder %s1108_s12, 3 }
   0x4   : > { %p137_p2 = pnand %p991_p0, %p136_p1 }
   0x6   : > { %140 = sbr.rel (%p137_p2) target bundleno = 425 (0x1a9), region = 28 }
   0xd   : > { %v1062_v0 = vld [vmem:[%s1717_s1 + $0x4] ss:$8 sps:$4 sm:$0xff]   ;;  %s992_s16 = sshll.u32 %s987_s13, 5  ;;  %v1064_v1 = vld [vmem:[%s1717_s1] ss:$8 sps:$4 sm:$0xff]   ;;  %v1110_v2 = vmov 0  }
   0xe   : > { %431 = vmatprep.mubr.bf16.mxu0 %v1110_v2  ;;  %511 = vmatprep.mubr.bf16.mxu1 %v1110_v2  ;;  %p162_p3 = scmp.lt.s32.totalorder %s992_s16, 63  ;;  %v1065_v3 = vld [vmem:[%s1717_s1 + $0x14] ss:$8 sps:$4 sm:$0xff]   ;;  %v1067_v4 = vld [vmem:[%s1717_s1 + $0x10] ss:$8 sps:$4 sm:$0xff]   ;;  %p1029_p4 = scmp.ne.s32.totalorder %s987_s13, 0 }
   0xf   : > { %399 = vmatprep.subr.bf16.mxu0 %v1062_v0  ;;  %1035 = vmatprep.subr.bf16.mxu1 %v1062_v0  ;;  %v1068_v5 = vld [vmem:[%s1717_s1 + $0x24] ss:$8 sps:$4 sm:$0xff]   ;;  %v1070_v6 = vld [vmem:[%s1717_s1 + $0x20] ss:$8 sps:$4 sm:$0xff]   ;;  %v1071_v7 = vld [vmem:[%s1717_s1 + $0x34] ss:$8 sps:$4 sm:$0xff]  }
  0x10   : > { %400 = vmatpush1.bf16.msra.mxu0 %v1064_v1  ;;  %1043 = vmatpush1.bf16.msra.mxu1 %v1064_v1  ;;  %s1771_s16 = smov (!%p162_p3, %s992_s16), 63  ;;  %v1073_v8 = vld [vmem:[%s1717_s1 + $0x30] ss:$8 sps:$4 sm:$0xff]   ;;  %v1074_v9 = vld [vmem:[%s1717_s1 + $0x44] ss:$8 sps:$4 sm:$0xff]  }
  0x11   : > { %401 = vmatprep.subr.bf16.mxu0 %v1065_v3  ;;  %1036 = vmatprep.subr.bf16.mxu1 %v1065_v3  ;;  %s993_s25 = sshll.u32 %s1771_s16, 2  ;;  %v1076_v10 = vld [vmem:[%s1717_s1 + $0x40] ss:$8 sps:$4 sm:$0xff]   ;;  %v1077_v11 = vld [vmem:[%s1717_s1 + $0x54] ss:$8 sps:$4 sm:$0xff]   ;;  %s1034_s27 = sshll.u32 %s1771_s16, 4 }
  0x12   : > { %s1172_s5 = scalar_lea.vmem %s1716_s0, %s993_s25  ;;  %v1079_v12 = vld [vmem:[%s1717_s1 + $0x50] ss:$8 sps:$4 sm:$0xff]   ;;  %v1080_v13 = vld [vmem:[%s1717_s1 + $0x64] ss:$8 sps:$4 sm:$0xff]   ;;  %v1082_v14 = vld [vmem:[%s1717_s1 + $0x60] ss:$8 sps:$4 sm:$0xff]   ;;  %s1235_s30 = scalar_lea.vmem %s1718_s2, %s1034_s27 }
  0x13   : > { %v1083_v15 = vld [vmem:[%s1717_s1 + $0x74] ss:$8 sps:$4 sm:$0xff]   ;;  %v1085_v16 = vld [vmem:[%s1717_s1 + $0x70] ss:$8 sps:$4 sm:$0xff]   ;;  %v1086_v17 = vld [vmem:[%s1172_s5] sm:$0xff]  }
  0x14   : > { %402 = vmatpush1.bf16.msra.mxu0 %v1067_v4  ;;  %1044 = vmatpush1.bf16.msra.mxu1 %v1067_v4  ;;  %v1087_v18 = vld [vmem:[%s1172_s5 + $0x40] sm:$0xff]   ;;  %v1088_v19 = vld [vmem:[%s1172_s5 + $0x8] sm:$0xff]   ;;  %v1090_v21 = vld [vmem:[%s1172_s5 + $0x10] sm:$0xff]  }
  0x15   : > { %403 = vmatprep.subr.bf16.mxu0 %v1068_v5  ;;  %1037 = vmatprep.subr.bf16.mxu1 %v1068_v5  ;;  %v1089_v20 = vld [vmem:[%s1172_s5 + $0x48] sm:$0xff]   ;;  %v1091_v22 = vld [vmem:[%s1172_s5 + $0x50] sm:$0xff]   ;;  %v1092_v23 = vld [vmem:[%s1172_s5 + $0x18] sm:$0xff]  }
  0x16   : > { %v1093_v24 = vld [vmem:[%s1172_s5 + $0x58] sm:$0xff]   ;;  %v1094_v25 = vld [vmem:[%s1172_s5 + $0x20] sm:$0xff]   ;;  %v1096_v27 = vld [vmem:[%s1172_s5 + $0x28] sm:$0xff]  }
  0x17   : > { %v1095_v26 = vld [vmem:[%s1172_s5 + $0x60] sm:$0xff]   ;;  %v1097_v28 = vld [vmem:[%s1172_s5 + $0x68] sm:$0xff]   ;;  %v1098_v29 = vld [vmem:[%s1172_s5 + $0x30] sm:$0xff]  }
  0x18   : > { %404 = vmatpush1.bf16.msra.mxu0 %v1070_v6  ;;  %1045 = vmatpush1.bf16.msra.mxu1 %v1070_v6  ;;  %v1099_v30 = vld [vmem:[%s1172_s5 + $0x70] sm:$0xff]   ;;  %v1100_v31 = vld [vmem:[%s1172_s5 + $0x38] sm:$0xff]  }
  0x19   : > { %405 = vmatprep.subr.bf16.mxu0 %v1071_v7  ;;  %1038 = vmatprep.subr.bf16.mxu1 %v1071_v7  ;;  %v1101_v32 = vld [vmem:[%s1172_s5 + $0x78] sm:$0xff]  }
  0x1c   : > { %406 = vmatpush1.bf16.msra.mxu0 %v1073_v8  ;;  %1046 = vmatpush1.bf16.msra.mxu1 %v1073_v8 }
  0x1d   : > { %407 = vmatprep.subr.bf16.mxu0 %v1074_v9  ;;  %1039 = vmatprep.subr.bf16.mxu1 %v1074_v9 }
  0x20   : > { %408 = vmatpush1.bf16.msra.mxu0 %v1076_v10  ;;  %1047 = vmatpush1.bf16.msra.mxu1 %v1076_v10 }
  0x21   : > { %409 = vmatprep.subr.bf16.mxu0 %v1077_v11  ;;  %1040 = vmatprep.subr.bf16.mxu1 %v1077_v11 }
  0x24   : > { %410 = vmatpush1.bf16.msra.mxu0 %v1079_v12  ;;  %1048 = vmatpush1.bf16.msra.mxu1 %v1079_v12 }
  0x25   : > { %411 = vmatprep.subr.bf16.mxu0 %v1080_v13  ;;  %1041 = vmatprep.subr.bf16.mxu1 %v1080_v13 }
  0x28   : > { %412 = vmatpush1.bf16.msra.mxu0 %v1082_v14  ;;  %1049 = vmatpush1.bf16.msra.mxu1 %v1082_v14 }
  0x29   : > { %413 = vmatprep.subr.bf16.mxu0 %v1083_v15  ;;  %1042 = vmatprep.subr.bf16.mxu1 %v1083_v15 }
  0x2c   : > { %414 = vmatpush1.bf16.msra.mxu0 %v1085_v16  ;;  %1050 = vmatpush1.bf16.msra.mxu1 %v1085_v16 }
  0x2f   : > { %432 = vmatmul.mubr.bf16.vlgmr.msra.gmra.mrb[0].mxu0 %v1086_v17  ;;  %512 = vmatmul.mubr.bf16.vlgmr.msra.gmra.mrb[0].mxu1 %v1087_v18 }
  0x30   : > { %441 = vmatprep.mubr.bf16.mxu0 %v1110_v2  ;;  %521 = vmatprep.mubr.bf16.mxu1 %v1110_v2 }
  0x37   : > { %442 = vmatmul.mubr.bf16.gmra.mrb[4].mxu0 %v1088_v19  ;;  %522 = vmatmul.mubr.bf16.gmra.mrb[4].mxu1 %v1089_v20 }
  0x38   : > { %451 = vmatprep.mubr.bf16.mxu0 %v1110_v2  ;;  %531 = vmatprep.mubr.bf16.mxu1 %v1110_v2 }
  0x3f   : > { %452 = vmatmul.mubr.bf16.gmra.mrb[8].mxu0 %v1090_v21  ;;  %532 = vmatmul.mubr.bf16.gmra.mrb[8].mxu1 %v1091_v22 }
  0x40   : > { %461 = vmatprep.mubr.bf16.mxu0 %v1110_v2  ;;  %541 = vmatprep.mubr.bf16.mxu1 %v1110_v2 }
  0x47   : > { %462 = vmatmul.mubr.bf16.gmra.mrb[12].mxu0 %v1092_v23  ;;  %542 = vmatmul.mubr.bf16.gmra.mrb[12].mxu1 %v1093_v24 }
  0x48   : > { %471 = vmatprep.mubr.bf16.mxu0 %v1110_v2  ;;  %551 = vmatprep.mubr.bf16.mxu1 %v1110_v2 }
  0x4f   : > { %472 = vmatmul.mubr.bf16.gmra.mrb[16].mxu0 %v1094_v25  ;;  %552 = vmatmul.mubr.bf16.gmra.mrb[16].mxu1 %v1095_v26 }
  0x50   : > { %481 = vmatprep.mubr.bf16.mxu0 %v1110_v2  ;;  %561 = vmatprep.mubr.bf16.mxu1 %v1110_v2 }
  0x57   : > { %482 = vmatmul.mubr.bf16.gmra.mrb[20].mxu0 %v1096_v27  ;;  %562 = vmatmul.mubr.bf16.gmra.mrb[20].mxu1 %v1097_v28 }
  0x58   : > { %491 = vmatprep.mubr.bf16.mxu0 %v1110_v2  ;;  %571 = vmatprep.mubr.bf16.mxu1 %v1110_v2 }
  0x5f   : > { %492 = vmatmul.mubr.bf16.gmra.mrb[24].mxu0 %v1098_v29  ;;  %572 = vmatmul.mubr.bf16.gmra.mrb[24].mxu1 %v1099_v30 }
  0x60   : > { %501 = vmatprep.mubr.bf16.mxu0 %v1110_v2  ;;  %581 = vmatprep.mubr.bf16.mxu1 %v1110_v2 }
  0x67   : > { %502 = vmatmul.mubr.bf16.gmra.mrb[28].mxu0 %v1100_v31  ;;  %582 = vmatmul.mubr.bf16.gmra.mrb[28].mxu1 %v1101_v32 }
 0x102   : > { %v1237_v33 = vpop.f32.mrb[0].mxu0  ;;  %v1239_v34 = vpop.f32.mrb[0].mxu1 }
 0x103   : > { %592 = vst [vmem:[%s1235_s30] sm:$0xff] %v1237_v33  ;;  %624 = vst [vmem:[%s1235_s30 + $0x100] sm:$0xff] %v1239_v34  ;;  %v1245_v35 = vpop.f32.mrb[1].mxu0  ;;  %v1247_v36 = vpop.f32.mrb[1].mxu1 }
 0x104   : > { %593 = vst [vmem:[%s1235_s30 + $0x8] sm:$0xff] %v1245_v35  ;;  %625 = vst [vmem:[%s1235_s30 + $0x108] sm:$0xff] %v1247_v36  ;;  %v1253_v37 = vpop.f32.mrb[2].mxu0  ;;  %v1255_v38 = vpop.f32.mrb[2].mxu1 }
 0x105   : > { %594 = vst [vmem:[%s1235_s30 + $0x10] sm:$0xff] %v1253_v37  ;;  %626 = vst [vmem:[%s1235_s30 + $0x110] sm:$0xff] %v1255_v38  ;;  %v1261_v39 = vpop.f32.mrb[3].mxu0  ;;  %v1263_v40 = vpop.f32.mrb[3].mxu1 }
 0x106   : > { %595 = vst [vmem:[%s1235_s30 + $0x18] sm:$0xff] %v1261_v39  ;;  %627 = vst [vmem:[%s1235_s30 + $0x118] sm:$0xff] %v1263_v40 }
 0x10a   : > { %v1269_v41 = vpop.f32.mrb[4].mxu0  ;;  %v1271_v42 = vpop.f32.mrb[4].mxu1 }
 0x10b   : > { %596 = vst [vmem:[%s1235_s30 + $0x20] sm:$0xff] %v1269_v41  ;;  %628 = vst [vmem:[%s1235_s30 + $0x120] sm:$0xff] %v1271_v42  ;;  %v1277_v43 = vpop.f32.mrb[5].mxu0  ;;  %v1279_v44 = vpop.f32.mrb[5].mxu1 }
 0x10c   : > { %597 = vst [vmem:[%s1235_s30 + $0x28] sm:$0xff] %v1277_v43  ;;  %629 = vst [vmem:[%s1235_s30 + $0x128] sm:$0xff] %v1279_v44  ;;  %v1285_v45 = vpop.f32.mrb[6].mxu0  ;;  %v1287_v46 = vpop.f32.mrb[6].mxu1 }
 0x10d   : > { %598 = vst [vmem:[%s1235_s30 + $0x30] sm:$0xff] %v1285_v45  ;;  %630 = vst [vmem:[%s1235_s30 + $0x130] sm:$0xff] %v1287_v46  ;;  %v1293_v47 = vpop.f32.mrb[7].mxu0  ;;  %v1295_v48 = vpop.f32.mrb[7].mxu1 }
 0x10e   : > { %599 = vst [vmem:[%s1235_s30 + $0x38] sm:$0xff] %v1293_v47  ;;  %631 = vst [vmem:[%s1235_s30 + $0x138] sm:$0xff] %v1295_v48 }
 0x112   : > { %v1301_v49 = vpop.f32.mrb[8].mxu0  ;;  %v1303_v50 = vpop.f32.mrb[8].mxu1 }
 0x113   : > { %600 = vst [vmem:[%s1235_s30 + $0x40] sm:$0xff] %v1301_v49  ;;  %632 = vst [vmem:[%s1235_s30 + $0x140] sm:$0xff] %v1303_v50  ;;  %v1309_v51 = vpop.f32.mrb[9].mxu0  ;;  %v1311_v52 = vpop.f32.mrb[9].mxu1 }
 0x114   : > { %601 = vst [vmem:[%s1235_s30 + $0x48] sm:$0xff] %v1309_v51  ;;  %633 = vst [vmem:[%s1235_s30 + $0x148] sm:$0xff] %v1311_v52  ;;  %v1317_v53 = vpop.f32.mrb[10].mxu0  ;;  %v1319_v54 = vpop.f32.mrb[10].mxu1 }
 0x115   : > { %602 = vst [vmem:[%s1235_s30 + $0x50] sm:$0xff] %v1317_v53  ;;  %634 = vst [vmem:[%s1235_s30 + $0x150] sm:$0xff] %v1319_v54  ;;  %v1325_v55 = vpop.f32.mrb[11].mxu0  ;;  %v1327_v56 = vpop.f32.mrb[11].mxu1 }
 0x116   : > { %603 = vst [vmem:[%s1235_s30 + $0x58] sm:$0xff] %v1325_v55  ;;  %635 = vst [vmem:[%s1235_s30 + $0x158] sm:$0xff] %v1327_v56 }
 0x11a   : > { %v1333_v57 = vpop.f32.mrb[12].mxu0  ;;  %v1335_v58 = vpop.f32.mrb[12].mxu1 }
 0x11b   : > { %604 = vst [vmem:[%s1235_s30 + $0x60] sm:$0xff] %v1333_v57  ;;  %636 = vst [vmem:[%s1235_s30 + $0x160] sm:$0xff] %v1335_v58  ;;  %v1341_v59 = vpop.f32.mrb[13].mxu0  ;;  %v1343_v60 = vpop.f32.mrb[13].mxu1 }
 0x11c   : > { %605 = vst [vmem:[%s1235_s30 + $0x68] sm:$0xff] %v1341_v59  ;;  %637 = vst [vmem:[%s1235_s30 + $0x168] sm:$0xff] %v1343_v60  ;;  %v1349_v61 = vpop.f32.mrb[14].mxu0  ;;  %v1351_v62 = vpop.f32.mrb[14].mxu1 }
 0x11d   : > { %606 = vst [vmem:[%s1235_s30 + $0x70] sm:$0xff] %v1349_v61  ;;  %638 = vst [vmem:[%s1235_s30 + $0x170] sm:$0xff] %v1351_v62  ;;  %v1357_v63 = vpop.f32.mrb[15].mxu0  ;;  %v1359_v0 = vpop.f32.mrb[15].mxu1 }
 0x11e   : > { %607 = vst [vmem:[%s1235_s30 + $0x78] sm:$0xff] %v1357_v63  ;;  %639 = vst [vmem:[%s1235_s30 + $0x178] sm:$0xff] %v1359_v0 }
 0x122   : > { %v1365_v1 = vpop.f32.mrb[16].mxu0  ;;  %v1367_v2 = vpop.f32.mrb[16].mxu1 }
 0x123   : > { %608 = vst [vmem:[%s1235_s30 + $0x80] sm:$0xff] %v1365_v1  ;;  %640 = vst [vmem:[%s1235_s30 + $0x180] sm:$0xff] %v1367_v2  ;;  %v1373_v3 = vpop.f32.mrb[17].mxu0  ;;  %v1375_v4 = vpop.f32.mrb[17].mxu1 }
 0x124   : > { %609 = vst [vmem:[%s1235_s30 + $0x88] sm:$0xff] %v1373_v3  ;;  %641 = vst [vmem:[%s1235_s30 + $0x188] sm:$0xff] %v1375_v4  ;;  %v1381_v5 = vpop.f32.mrb[18].mxu0  ;;  %v1383_v6 = vpop.f32.mrb[18].mxu1 }
 0x125   : > { %610 = vst [vmem:[%s1235_s30 + $0x90] sm:$0xff] %v1381_v5  ;;  %642 = vst [vmem:[%s1235_s30 + $0x190] sm:$0xff] %v1383_v6  ;;  %v1389_v7 = vpop.f32.mrb[19].mxu0  ;;  %v1391_v8 = vpop.f32.mrb[19].mxu1 }
 0x126   : > { %611 = vst [vmem:[%s1235_s30 + $0x98] sm:$0xff] %v1389_v7  ;;  %643 = vst [vmem:[%s1235_s30 + $0x198] sm:$0xff] %v1391_v8 }
 0x12a   : > { %v1397_v9 = vpop.f32.mrb[20].mxu0  ;;  %v1399_v10 = vpop.f32.mrb[20].mxu1 }
 0x12b   : > { %1744 = vst [vmem:[#allocation2_spill] sm:$0xff] %v1399_v10  ;;  %612 = vst [vmem:[%s1235_s30 + $0xa0] sm:$0xff] %v1397_v9  ;;  %v1405_v11 = vpop.f32.mrb[21].mxu0  ;;  %v1407_v12 = vpop.f32.mrb[21].mxu1 }
 0x12c   : > { %644 = vst [vmem:[%s1235_s30 + $0x1a0] sm:$0xff] %v1399_v10  ;;  %1745 = vst [vmem:[#allocation3_spill] sm:$0xff] %v1407_v12  ;;  %v1413_v13 = vpop.f32.mrb[22].mxu0  ;;  %v1415_v14 = vpop.f32.mrb[22].mxu1 }
 0x12d   : > { %613 = vst [vmem:[%s1235_s30 + $0xa8] sm:$0xff] %v1405_v11  ;;  %645 = vst [vmem:[%s1235_s30 + $0x1a8] sm:$0xff] %v1407_v12  ;;  %v1421_v15 = vpop.f32.mrb[23].mxu0  ;;  %v1423_v16 = vpop.f32.mrb[23].mxu1 }
 0x12e   : > { %1746 = vst [vmem:[#allocation4_spill] sm:$0xff] %v1415_v14  ;;  %614 = vst [vmem:[%s1235_s30 + $0xb0] sm:$0xff] %v1413_v13 }
 0x12f   : > { %646 = vst [vmem:[%s1235_s30 + $0x1b0] sm:$0xff] %v1415_v14  ;;  %1747 = vst [vmem:[#allocation5_spill] sm:$0xff] %v1423_v16 }
 0x130   : > { %615 = vst [vmem:[%s1235_s30 + $0xb8] sm:$0xff] %v1421_v15  ;;  %647 = vst [vmem:[%s1235_s30 + $0x1b8] sm:$0xff] %v1423_v16 }
 0x132   : > { %v1429_v17 = vpop.f32.mrb[24].mxu0  ;;  %v1431_v18 = vpop.f32.mrb[24].mxu1 }
 0x133   : > { %1748 = vst [vmem:[#allocation6_spill] sm:$0xff] %v1431_v18  ;;  %616 = vst [vmem:[%s1235_s30 + $0xc0] sm:$0xff] %v1429_v17  ;;  %v1437_v19 = vpop.f32.mrb[25].mxu0  ;;  %v1439_v20 = vpop.f32.mrb[25].mxu1 }
 0x134   : > { %648 = vst [vmem:[%s1235_s30 + $0x1c0] sm:$0xff] %v1431_v18  ;;  %1749 = vst [vmem:[#allocation7_spill] sm:$0xff] %v1439_v20  ;;  %v1445_v21 = vpop.f32.mrb[26].mxu0  ;;  %v1447_v22 = vpop.f32.mrb[26].mxu1 }
 0x135   : > { %617 = vst [vmem:[%s1235_s30 + $0xc8] sm:$0xff] %v1437_v19  ;;  %649 = vst [vmem:[%s1235_s30 + $0x1c8] sm:$0xff] %v1439_v20  ;;  %v1453_v23 = vpop.f32.mrb[27].mxu0  ;;  %v1455_v24 = vpop.f32.mrb[27].mxu1 }
 0x136   : > { %1750 = vst [vmem:[#allocation8_spill] sm:$0xff] %v1447_v22  ;;  %618 = vst [vmem:[%s1235_s30 + $0xd0] sm:$0xff] %v1445_v21 }
 0x137   : > { %650 = vst [vmem:[%s1235_s30 + $0x1d0] sm:$0xff] %v1447_v22  ;;  %1751 = vst [vmem:[#allocation9_spill] sm:$0xff] %v1455_v24 }
 0x138   : > { %619 = vst [vmem:[%s1235_s30 + $0xd8] sm:$0xff] %v1453_v23  ;;  %651 = vst [vmem:[%s1235_s30 + $0x1d8] sm:$0xff] %v1455_v24 }
 0x13a   : > { %v1461_v25 = vpop.f32.mrb[28].mxu0  ;;  %v1463_v26 = vpop.f32.mrb[28].mxu1  ;;  %659 = sbr.rel (%p1029_p4) target bundleno = 322 (0x142), region = 32 }
 0x13b   : > { %1752 = vst [vmem:[#allocation10_spill] sm:$0xff] %v1463_v26  ;;  %620 = vst [vmem:[%s1235_s30 + $0xe0] sm:$0xff] %v1461_v25  ;;  %v1469_v27 = vpop.f32.mrb[29].mxu0  ;;  %v1471_v28 = vpop.f32.mrb[29].mxu1 }
 0x13c   : > { %652 = vst [vmem:[%s1235_s30 + $0x1e0] sm:$0xff] %v1463_v26  ;;  %1753 = vst [vmem:[#allocation11_spill] sm:$0xff] %v1471_v28  ;;  %v1477_v29 = vpop.f32.mrb[30].mxu0  ;;  %v1479_v30 = vpop.f32.mrb[30].mxu1 }
 0x13d   : > { %621 = vst [vmem:[%s1235_s30 + $0xe8] sm:$0xff] %v1469_v27  ;;  %653 = vst [vmem:[%s1235_s30 + $0x1e8] sm:$0xff] %v1471_v28  ;;  %v1485_v31 = vpop.f32.mrb[31].mxu0  ;;  %v1487_v32 = vpop.f32.mrb[31].mxu1  ;;  %v1111_v28 = vmov (!%p1029_p4), 0.0  }
 0x13e   : > { %1754 = vst [vmem:[#allocation12_spill] sm:$0xff] %v1479_v30  ;;  %622 = vst [vmem:[%s1235_s30 + $0xf0] sm:$0xff] %v1477_v29 }
 0x13f   : > { %654 = vst [vmem:[%s1235_s30 + $0x1f0] sm:$0xff] %v1479_v30  ;;  %1755 = vst [vmem:[#allocation13_spill] sm:$0xff] %v1487_v32 }
 0x140   : > { %623 = vst [vmem:[%s1235_s30 + $0xf8] sm:$0xff] %v1485_v31  ;;  %655 = vst [vmem:[%s1235_s30 + $0x1f8] sm:$0xff] %v1487_v32 }
 0x141   : > { %660 = vst [vmem:[%s1719_s3] sm:$0xff] %v1111_v28  ;;  %661 = vst [vmem:[%s1719_s3 + $0x8] sm:$0xff] %v1111_v28 }
 0x142 PF: > { %v663_v30 = vadd.f32 %v1253_v37, %v1237_v33  ;;  %v700_v32 = vadd.f32 %v1261_v39, %v1245_v35 }
 0x144   : > { %v664_v26 = vadd.f32 %v663_v30, %v1269_v41  ;;  %v701_v24 = vadd.f32 %v700_v32, %v1277_v43 }
 0x146   : > { %v665_v22 = vadd.f32 %v664_v26, %v1285_v45  ;;  %v702_v20 = vadd.f32 %v701_v24, %v1293_v47 }
 0x148   : > { %v666_v18 = vadd.f32 %v665_v22, %v1301_v49  ;;  %v703_v16 = vadd.f32 %v702_v20, %v1309_v51 }
 0x14a   : > { %v667_v28 = vadd.f32 %v666_v18, %v1317_v53  ;;  %v704_v14 = vadd.f32 %v703_v16, %v1325_v55 }
 0x14c   : > { %v668_v12 = vadd.f32 %v667_v28, %v1333_v57  ;;  %v705_v10 = vadd.f32 %v704_v14, %v1341_v59  ;;  %v764_v28 = vmul.f32 %v1237_v33, %v1237_v33 }
 0x14e   : > { %v669_v30 = vadd.f32 %v668_v12, %v1349_v61  ;;  %v706_v32 = vadd.f32 %v705_v10, %v1357_v63  ;;  %v766_v12 = vmul.f32 %v1253_v37, %v1253_v37  ;;  %v769_v37 = vmul.f32 %v1277_v43, %v1277_v43 }
 0x150   : > { %v670_v26 = vadd.f32 %v669_v30, %v1365_v1  ;;  %v707_v24 = vadd.f32 %v706_v32, %v1373_v3  ;;  %v765_v30 = vmul.f32 %v1245_v35, %v1245_v35  ;;  %v767_v32 = vmul.f32 %v1261_v39, %v1261_v39 }
 0x151   : > { %v771_v39 = vmul.f32 %v1293_v47, %v1293_v47 }
 0x152   : > { %v671_v22 = vadd.f32 %v670_v26, %v1381_v5  ;;  %v708_v20 = vadd.f32 %v707_v24, %v1389_v7  ;;  %v768_v26 = vmul.f32 %v1269_v41, %v1269_v41  ;;  %v772_v41 = vmul.f32 %v1301_v49, %v1301_v49 }
 0x153   : > { %v775_v49 = vmul.f32 %v1325_v55, %v1325_v55 }
 0x154   : > { %v672_v18 = vadd.f32 %v671_v22, %v1397_v9  ;;  %v709_v16 = vadd.f32 %v708_v20, %v1405_v11  ;;  %v770_v22 = vmul.f32 %v1285_v45, %v1285_v45  ;;  %v828_v20 = vadd.f32 %v766_v12, %v764_v28 }
 0x155   : > { %v773_v45 = vmul.f32 %v1309_v51, %v1309_v51  ;;  %v774_v12 = vmul.f32 %v1317_v53, %v1317_v53  ;;  %v777_v53 = vmul.f32 %v1341_v59, %v1341_v59 }
 0x156   : > { %v673_v10 = vadd.f32 %v672_v18, %v1413_v13  ;;  %v710_v14 = vadd.f32 %v709_v16, %v1421_v15  ;;  %v865_v16 = vadd.f32 %v767_v32, %v765_v30  ;;  %v776_v32 = vmul.f32 %v1333_v57, %v1333_v57 }
 0x157   : > { %v779_v57 = vmul.f32 %v1357_v63, %v1357_v63 }
 0x158   : > { %v674_v24 = vadd.f32 %v673_v10, %v1429_v17  ;;  %v711_v33 = vadd.f32 %v710_v14, %v1437_v19  ;;  %v829_v10 = vadd.f32 %v828_v20, %v768_v26  ;;  %v866_v28 = vadd.f32 %v865_v16, %v769_v37 }
 0x159   : > { %v780_v16 = vmul.f32 %v1365_v1, %v1365_v1  ;;  %v783_v1 = vmul.f32 %v1389_v7, %v1389_v7 }
 0x15a   : > { %v675_v18 = vadd.f32 %v674_v24, %v1445_v21  ;;  %v712_v35 = vadd.f32 %v711_v33, %v1453_v23  ;;  %v830_v24 = vadd.f32 %v829_v10, %v770_v22  ;;  %v867_v30 = vadd.f32 %v866_v28, %v771_v39 }
 0x15b   : > { %v778_v22 = vmul.f32 %v1349_v61, %v1349_v61  ;;  %v781_v61 = vmul.f32 %v1373_v3, %v1373_v3 }
 0x15c   : > { %v676_v14 = vadd.f32 %v675_v18, %v1461_v25  ;;  %v713_v43 = vadd.f32 %v712_v35, %v1469_v27  ;;  %v831_v26 = vadd.f32 %v830_v24, %v772_v41  ;;  %v868_v37 = vadd.f32 %v867_v30, %v773_v45 }
 0x15d   : > { %v784_v24 = vmul.f32 %v1397_v9, %v1397_v9  ;;  %v786_v30 = vmul.f32 %v1413_v13, %v1413_v13  ;;  %v787_v9 = vmul.f32 %v1421_v15, %v1421_v15  ;;  %v789_v13 = vmul.f32 %v1437_v19, %v1437_v19 }
 0x15e   : > { %v677_v33 = vadd.f32 %v676_v14, %v1477_v29  ;;  %v714_v47 = vadd.f32 %v713_v43, %v1485_v31  ;;  %v832_v18 = vadd.f32 %v831_v26, %v774_v12  ;;  %v869_v39 = vadd.f32 %v868_v37, %v775_v49 }
 0x15f   : > { %v782_v43 = vmul.f32 %v1381_v5, %v1381_v5  ;;  %v785_v5 = vmul.f32 %v1405_v11, %v1405_v11 }
 0x160   : > { %v678_v20 = vadd.f32 %v677_v33, %v1239_v34  ;;  %v715_v51 = vadd.f32 %v714_v47, %v1247_v36  ;;  %v833_v41 = vadd.f32 %v832_v18, %v776_v32  ;;  %v870_v14 = vadd.f32 %v869_v39, %v777_v53 }
 0x161   : > { %v790_v18 = vmul.f32 %v1445_v21, %v1445_v21  ;;  %v792_v39 = vmul.f32 %v1461_v25, %v1461_v25  ;;  %v793_v21 = vmul.f32 %v1469_v27, %v1469_v27  ;;  %v795_v25 = vmul.f32 %v1485_v31, %v1485_v31  ;;  %v1757_v27 = vld [vmem:[#allocation3_spill] sm:$0xff]  ;;  %v1759_v31 = vld [vmem:[#allocation5_spill] sm:$0xff] }
 0x162   : > { %v679_v35 = vadd.f32 %v678_v20, %v1255_v38  ;;  %v716_v55 = vadd.f32 %v715_v51, %v1263_v40  ;;  %v834_v45 = vadd.f32 %v833_v41, %v778_v22  ;;  %v871_v12 = vadd.f32 %v870_v14, %v779_v57 }
 0x163   : > { %v788_v51 = vmul.f32 %v1429_v17, %v1429_v17  ;;  %v791_v17 = vmul.f32 %v1453_v23, %v1453_v23 }
 0x164   : > { %v680_v10 = vadd.f32 %v679_v35, %v1271_v42  ;;  %v717_v59 = vadd.f32 %v716_v55, %v1279_v44  ;;  %v835_v33 = vadd.f32 %v834_v45, %v780_v16  ;;  %v872_v49 = vadd.f32 %v871_v12, %v781_v61 }
 0x165   : > { %v796_v45 = vmul.f32 %v1239_v34, %v1239_v34  ;;  %v799_v34 = vmul.f32 %v1263_v40, %v1263_v40  ;;  %v1763_v40 = vld [vmem:[#allocation9_spill] sm:$0xff] }
 0x166   : > { %v681_v28 = vadd.f32 %v680_v10, %v1287_v46  ;;  %v718_v63 = vadd.f32 %v717_v59, %v1295_v48  ;;  %v836_v32 = vadd.f32 %v835_v33, %v782_v43  ;;  %v873_v20 = vadd.f32 %v872_v49, %v783_v1 }
 0x167   : > { %v794_v59 = vmul.f32 %v1477_v29, %v1477_v29  ;;  %v797_v29 = vmul.f32 %v1247_v36, %v1247_v36  ;;  %v798_v33 = vmul.f32 %v1255_v38, %v1255_v38  ;;  %v1761_v36 = vld [vmem:[#allocation7_spill] sm:$0xff]  ;;  %v801_v38 = vmul.f32 %v1279_v44, %v1279_v44 }
 0x168   : > { %v682_v47 = vadd.f32 %v681_v28, %v1303_v50  ;;  %v719_v3 = vadd.f32 %v718_v63, %v1311_v52  ;;  %v837_v53 = vadd.f32 %v836_v32, %v784_v24  ;;  %v874_v22 = vadd.f32 %v873_v20, %v785_v5  ;;  %v1756_v63 = vld [vmem:[#allocation2_spill] sm:$0xff]  ;;  %v1765_v44 = vld [vmem:[#allocation11_spill] sm:$0xff] }
 0x169   : > { %v800_v32 = vmul.f32 %v1271_v42, %v1271_v42  ;;  %v803_v42 = vmul.f32 %v1295_v48, %v1295_v48  ;;  %v1767_v48 = vld [vmem:[#allocation13_spill] sm:$0xff] }
 0x16a   : > { %v683_v26 = vadd.f32 %v682_v47, %v1319_v54  ;;  %v720_v7 = vadd.f32 %v719_v3, %v1327_v56  ;;  %v838_v35 = vadd.f32 %v837_v53, %v786_v30  ;;  %v875_v57 = vadd.f32 %v874_v22, %v787_v9  ;;  %v1758_v3 = vld [vmem:[#allocation4_spill] sm:$0xff] }
 0x16b   : > { %v802_v53 = vmul.f32 %v1287_v46, %v1287_v46  ;;  %v805_v46 = vmul.f32 %v1311_v52, %v1311_v52  ;;  %v809_v52 = vmul.f32 %v1343_v60, %v1343_v60 }
 0x16c   : > { %v684_v37 = vadd.f32 %v683_v26, %v1335_v58  ;;  %v721_v11 = vadd.f32 %v720_v7, %v1343_v60  ;;  %v839_v16 = vadd.f32 %v838_v35, %v788_v51  ;;  %v876_v10 = vadd.f32 %v875_v57, %v789_v13  ;;  %v1760_v7 = vld [vmem:[#allocation6_spill] sm:$0xff] }
 0x16d   : > { %v804_v35 = vmul.f32 %v1303_v50, %v1303_v50  ;;  %v807_v50 = vmul.f32 %v1327_v56, %v1327_v56 }
 0x16e   : > { %v685_v55 = vadd.f32 %v684_v37, %v1351_v62  ;;  %v722_v15 = vadd.f32 %v721_v11, %v1359_v0  ;;  %v840_v61 = vadd.f32 %v839_v16, %v790_v18  ;;  %v877_v43 = vadd.f32 %v876_v10, %v791_v17  ;;  %v1762_v11 = vld [vmem:[#allocation8_spill] sm:$0xff] }
 0x16f   : > { %v806_v16 = vmul.f32 %v1319_v54, %v1319_v54  ;;  %v1112_v54 = vmov 1966171168  }
 0x170   : > { %v686_v41 = vadd.f32 %v685_v55, %v1367_v2  ;;  %v723_v19 = vadd.f32 %v722_v15, %v1375_v4  ;;  %v841_v28 = vadd.f32 %v840_v61, %v792_v39  ;;  %v878_v24 = vadd.f32 %v877_v43, %v793_v21  ;;  %v1764_v15 = vld [vmem:[#allocation10_spill] sm:$0xff] }
 0x171   : > { %v808_v61 = vmul.f32 %v1335_v58, %v1335_v58 }
 0x172   : > { %v687_v14 = vadd.f32 %v686_v41, %v1383_v6  ;;  %v724_v23 = vadd.f32 %v723_v19, %v1391_v8  ;;  %v842_v47 = vadd.f32 %v841_v28, %v794_v59  ;;  %v879_v30 = vadd.f32 %v878_v24, %v795_v25  ;;  %v1766_v19 = vld [vmem:[#allocation12_spill] sm:$0xff] }
 0x173   : > { %v743_v28 = vlaneseq  ;;  %v811_v24 = vmul.f32 %v1359_v0, %v1359_v0  ;;  %v815_v0 = vmul.f32 %v1391_v8, %v1391_v8  ;;  %v819_v8 = vmul.f32 %v1759_v31, %v1759_v31 }
 0x174   : > { %v688_v1 = vadd.f32 %v687_v14, %v1756_v63  ;;  %v725_v12 = vadd.f32 %v724_v23, %v1757_v27  ;;  %v843_v26 = vadd.f32 %v842_v47, %v796_v45  ;;  %v880_v51 = vadd.f32 %v879_v30, %v797_v29 }
 0x175   : > { %v741_v45 = vunpack.c.l.s4 %v1112_v54  ;;  %vm1692_vm0 = vcmp.lt.s32.totalorder %v743_v28, 256 }
 0x176   : > { %v689_v5 = vadd.f32 %v688_v1, %v1758_v3  ;;  %v726_v49 = vadd.f32 %v725_v12, %v1759_v31  ;;  %v844_v37 = vadd.f32 %v843_v26, %v798_v33  ;;  %v881_v18 = vadd.f32 %v880_v51, %v799_v34  ;;  %v662_v31 = vld [vmem:[%s1719_s3] ss:$8 sm:$0x3] }
 0x177   : > { %v810_v1 = vmul.f32 %v1351_v62, %v1351_v62  ;;  %v812_v33 = vmul.f32 %v1367_v2, %v1367_v2  ;;  %v742_v30 = vunpack.c.0.s8 %v741_v45  ;;  %v814_v62 = vmul.f32 %v1383_v6, %v1383_v6 }
 0x178   : > { %v690_v9 = vadd.f32 %v689_v5, %v1760_v7  ;;  %v727_v20 = vadd.f32 %v726_v49, %v1761_v36  ;;  %v845_v55 = vadd.f32 %v844_v37, %v800_v32  ;;  %v882_v39 = vadd.f32 %v881_v18, %v801_v38 }
 0x179   : > { %v813_v49 = vmul.f32 %v1375_v4, %v1375_v4  ;;  %v744_v32 = vshrl.u32 %v743_v28, 7  ;;  %v816_v2 = vmul.f32 %v1756_v63, %v1756_v63  ;;  %v817_v4 = vmul.f32 %v1757_v27, %v1757_v27 }
 0x17a   : > { %v691_v13 = vadd.f32 %v690_v9, %v1762_v11  ;;  %v728_v22 = vadd.f32 %v727_v20, %v1763_v40  ;;  %v846_v41 = vadd.f32 %v845_v55, %v802_v53  ;;  %v883_v59 = vadd.f32 %v882_v39, %v803_v42 }
 0x17b   : > { %v818_v6 = vmul.f32 %v1758_v3, %v1758_v3  ;;  %v820_v63 = vmul.f32 %v1760_v7, %v1760_v7  ;;  %v821_v27 = vmul.f32 %v1761_v36, %v1761_v36  ;;  %v822_v39 = vmul.f32 %v1762_v11, %v1762_v11 }
 0x17c   : > { %v692_v17 = vadd.f32 %v691_v13, %v1764_v15  ;;  %v729_v57 = vadd.f32 %v728_v22, %v1765_v44  ;;  %v847_v14 = vadd.f32 %v846_v41, %v804_v35  ;;  %v884_v43 = vadd.f32 %v883_v59, %v805_v46 }
 0x17d   : > { %v745_v22 = vsub.s32 %v742_v30, %v744_v32  ;;  %v823_v41 = vmul.f32 %v1763_v40, %v1763_v40  ;;  %v824_v7 = vmul.f32 %v1764_v15, %v1764_v15  ;;  %v825_v36 = vmul.f32 %v1765_v44, %v1765_v44 }
 0x17e   : > { %v693_v21 = vadd.f32 %v692_v17, %v1766_v19  ;;  %v730_v10 = vadd.f32 %v729_v57, %v1767_v48  ;;  %v848_v12 = vadd.f32 %v847_v14, %v806_v16  ;;  %v885_v58 = vadd.f32 %v884_v43, %v807_v50 }
 0x17f   : > { %v826_v40 = vmul.f32 %v1766_v19, %v1766_v19 }
 0x180   : > { %v694_v23 = vrot.slane %v693_v21, 4  ;;  %v731_v25 = vrot.slane %v730_v10, 4  ;;  %v849_v47 = vadd.f32 %v848_v12, %v808_v61  ;;  %v886_v34 = vadd.f32 %v885_v58, %v809_v52 }
 0x182   : > { %v695_v29 = vadd.f32 %v694_v23, %v693_v21  ;;  %v732_v56 = vadd.f32 %v731_v25, %v730_v10  ;;  %v850_v26 = vadd.f32 %v849_v47, %v810_v1  ;;  %v887_v38 = vadd.f32 %v886_v34, %v811_v24 }
 0x183   : > { %v827_v23 = vmul.f32 %v1767_v48, %v1767_v48 }
 0x184   : > { %v696_v5 = vrot.slane %v695_v29, 2  ;;  %v733_v60 = vrot.slane %v732_v56, 2  ;;  %v851_v51 = vadd.f32 %v850_v26, %v812_v33  ;;  %v888_v13 = vadd.f32 %v887_v38, %v813_v49 }
 0x186   : > { %v697_v9 = vadd.f32 %v696_v5, %v695_v29  ;;  %v734_v20 = vadd.f32 %v733_v60, %v732_v56  ;;  %v852_v42 = vadd.f32 %v851_v51, %v814_v62  ;;  %v889_v55 = vadd.f32 %v888_v13, %v815_v0  ;;  %v1030_v60 = vld [vmem:[%s1719_s3 + $0x1] ss:$8 sm:$0x3] }
 0x188   : > { %v698_v53 = vrot.slane %v697_v9, 1  ;;  %v735_v37 = vrot.slane %v734_v20, 1  ;;  %v853_v17 = vadd.f32 %v852_v42, %v816_v2  ;;  %v890_v46 = vadd.f32 %v889_v55, %v817_v4 }
 0x18a   : > { %v699_v18 = vadd.f32 %v698_v53, %v697_v9  ;;  %v736_v35 = vadd.f32 %v735_v37, %v734_v20  ;;  %v854_v3 = vadd.f32 %v853_v17, %v818_v6  ;;  %v891_v21 = vadd.f32 %v890_v46, %v819_v8 }
 0x18c   : > { %v739_v57 = vcombine.low %v699_v18, %v736_v35  ;;  %v855_v10 = vadd.f32 %v854_v3, %v820_v63  ;;  %v892_v59 = vadd.f32 %v891_v21, %v821_v27 }
 0x18e   : > { %v746_v16 = vrot.slane %v739_v57, %v745_v22  ;;  %v856_v61 = vadd.f32 %v855_v10, %v822_v39  ;;  %v893_v25 = vadd.f32 %v892_v59, %v823_v41 }
 0x190   : > { %v753_v50 = vrot.slane %v746_v16, %v745_v22  ;;  %v857_v15 = vadd.f32 %v856_v61, %v824_v7  ;;  %v894_v44 = vadd.f32 %v893_v25, %v825_v36 }
 0x192   : > { %v755_v14 = vadd.f32 %v753_v50, %v662_v31  ;;  %v858_v52 = vadd.f32 %v857_v15, %v826_v40  ;;  %v895_v43 = vadd.f32 %v894_v44, %v827_v23 }
 0x194   : > { %760 = vst.msk [vmem:[%s1719_s3] ss:$8 sm:$0x3] %vm1692_vm0, %v755_v14  ;;  %v859_v54 = vrot.slane %v858_v52, 4  ;;  %v896_v45 = vrot.slane %v895_v43, 4 }
 0x196   : > { %v860_v28 = vadd.f32 %v859_v54, %v858_v52  ;;  %v897_v19 = vadd.f32 %v896_v45, %v895_v43 }
 0x198   : > { %v861_v1 = vrot.slane %v860_v28, 2  ;;  %v898_v12 = vrot.slane %v897_v19, 2 }
 0x19a   : > { %v862_v29 = vadd.f32 %v861_v1, %v860_v28  ;;  %v899_v56 = vadd.f32 %v898_v12, %v897_v19 }
 0x19c   : > { %v863_v48 = vrot.slane %v862_v29, 1  ;;  %v900_v24 = vrot.slane %v899_v56, 1 }
 0x19e   : > { %v864_v58 = vadd.f32 %v863_v48, %v862_v29  ;;  %v901_v33 = vadd.f32 %v900_v24, %v899_v56 }
 0x1a0   : > { %v904_v47 = vcombine.low %v864_v58, %v901_v33 }
 0x1a2   : > { %v911_v5 = vrot.slane %v904_v47, %v745_v22 }
 0x1a4   : > { %v918_v49 = vrot.slane %v911_v5, %v745_v22 }
 0x1a6   : > { %v920_v34 = vadd.f32 %v1030_v60, %v918_v49 }
 0x1a8   : > { %1031 = vst.msk [vmem:[%s1719_s3 + $0x1] ss:$8 sm:$0x3] %vm1692_vm0, %v920_v34 }
 0x1a9 PF: > { %s14_s12 = sadd.s32 1, %s1108_s12  }
 0x1aa   : > { %p11_p5 = scmp.ge.s32.totalorder %s14_s12, 4  }
 0x1ac   :  { %13 = sbr.rel (!%p11_p5) target bundleno = 1 (0x1), region = 71 }

// kernel: channel_compression_forward.7
= control target key start
LH: loop header
LB: loop body
LE: loop exit
PB: predicated region body
PF: predicated region fallthrough
CT: control target
= control target key end

     0   :  { %s964_s21 = smov 0   ;;  %s966_s22 = smov 0   ;;  %s1344_s0 = inlined_call_operand.vmem [shape: f32[512,128], index: 0, kind: input, shape index: {}]   ;;  %s1345_s1 = inlined_call_operand.vmem [shape: f32[1,128], index: 1, kind: input, shape index: {}]   ;;  %s1346_s2 = inlined_call_operand.vmem [shape: f32[1,128], index: 2, kind: input, shape index: {}]   ;;  %s1347_s3 = inlined_call_operand.vmem [shape: f32[512,256], index: 3, kind: input, shape index: {}]   ;;  %s1348_s4 = inlined_call_operand.vmem [shape: f32[1,128], index: 4, kind: input, shape index: {}]   ;;  %s1349_s5 = inlined_call_operand.vmem [shape: f32[1,128], index: 5, kind: input, shape index: {}]   ;;  %s1350_s6 = inlined_call_operand.vmem [shape: f32[512,128], index: 6, kind: output, shape index: {}]  }
   0x1   :  { %s968_s23 = smov 0  }
   0x2 LB: > { %s829_s24 = sadd.s32 4294967295, %s927_s23   ;;  %s981_s25 = sadd.s32 1, %s927_s23   ;;  %s927_s23 = sphi %s968_s23, %s1353_s23   ;;  %s923_s22 = sphi %s966_s22, %s1352_s22   ;;  %s919_s21 = sphi %s964_s21, %s1351_s21  }
   0x3   : > { %s88_s26 = ssub.s32 %s927_s23, %s981_s25  ;;  %s91_s27 = sadd.s32 1, %s923_s22 }
   0x4   : > { %p89_p0 = scmp.eq.s32.totalorder %s88_s26, 0  ;;  %p98_p1 = scmp.ne.s32.totalorder %s923_s22, %s919_s21 }
   0x5   : > { %p99_p2 = scmp.eq.s32.totalorder %s927_s23, 0  ;;  %p832_p4 = scmp.ge.s32.totalorder %s927_s23, 2 }
   0x6   : > { %s990_s28 = scalar_select %p89_p0, %s923_s22, %s91_s27  }
   0x7   : > { %p100_p3 = por %p99_p2, %p98_p1  ;;  %204 = sbr.rel (%p832_p4) target bundleno = 34 (0x22), region = 32 }
   0xe   : > { %216 = sbr.rel (!%p100_p3) target bundleno = 34 (0x22), region = 40  ;;  %s218_s29 = sand.u32 (%p100_p3), 1, %s923_s22  }
   0xf   : > { %s880_s30 = sshll.u32 (%p100_p3), %s927_s23, 9  ;;  %s833_s7 = sshll.u32 (%p100_p3), %s218_s29, 8 }
  0x10   : > { %s998_s10 = scalar_lea.vmem (%p100_p3), %s1347_s3, %s880_s30  ;;  %s1003_s11 = scalar_lea.vmem (%p100_p3), [#allocation2], %s833_s7 }
  0x11   : > { %v836_v0 = vld [vmem:[%s998_s10 + $0x8] sm:$0xff] (%p100_p3)  ;;  %v837_v1 = vld [vmem:[%s998_s10 + $0x18] sm:$0xff] (%p100_p3) }
  0x12   : > { %v838_v2 = vld [vmem:[%s998_s10 + $0x28] sm:$0xff] (%p100_p3)  ;;  %316 = vst [vmem:[%s1003_s11] sm:$0xff] (%p100_p3), %v836_v0  ;;  %318 = vst [vmem:[%s1003_s11 + $0x8] sm:$0xff] (%p100_p3), %v837_v1  ;;  %v839_v3 = vld [vmem:[%s998_s10 + $0x38] sm:$0xff] (%p100_p3) }
  0x13   : > { %320 = vst [vmem:[%s1003_s11 + $0x10] sm:$0xff] (%p100_p3), %v838_v2  ;;  %v840_v4 = vld [vmem:[%s998_s10 + $0x48] sm:$0xff] (%p100_p3)  ;;  %v841_v5 = vld [vmem:[%s998_s10 + $0x58] sm:$0xff] (%p100_p3)  ;;  %322 = vst [vmem:[%s1003_s11 + $0x18] sm:$0xff] (%p100_p3), %v839_v3 }
  0x14   : > { %324 = vst [vmem:[%s1003_s11 + $0x20] sm:$0xff] (%p100_p3), %v840_v4  ;;  %326 = vst [vmem:[%s1003_s11 + $0x28] sm:$0xff] (%p100_p3), %v841_v5  ;;  %v842_v6 = vld [vmem:[%s998_s10 + $0x68] sm:$0xff] (%p100_p3)  ;;  %v843_v7 = vld [vmem:[%s998_s10 + $0x78] sm:$0xff] (%p100_p3) }
  0x15   : > { %v844_v8 = vld [vmem:[%s998_s10 + $0x88] sm:$0xff]  ;;  %328 = vst [vmem:[%s1003_s11 + $0x30] sm:$0xff] %v842_v6  ;;  %330 = vst [vmem:[%s1003_s11 + $0x38] sm:$0xff] %v843_v7  ;;  %v845_v9 = vld [vmem:[%s998_s10 + $0x98] sm:$0xff] }
  0x16   : > { %332 = vst [vmem:[%s1003_s11 + $0x40] sm:$0xff] %v844_v8  ;;  %v846_v10 = vld [vmem:[%s998_s10 + $0xa8] sm:$0xff]  ;;  %v847_v11 = vld [vmem:[%s998_s10 + $0xb8] sm:$0xff]  ;;  %334 = vst [vmem:[%s1003_s11 + $0x48] sm:$0xff] %v845_v9 }
  0x17   : > { %336 = vst [vmem:[%s1003_s11 + $0x50] sm:$0xff] %v846_v10  ;;  %338 = vst [vmem:[%s1003_s11 + $0x58] sm:$0xff] %v847_v11  ;;  %v848_v12 = vld [vmem:[%s998_s10 + $0xc8] sm:$0xff]  ;;  %v849_v13 = vld [vmem:[%s998_s10 + $0xd8] sm:$0xff] }
  0x18   : > { %v850_v14 = vld [vmem:[%s998_s10 + $0xe8] sm:$0xff]  ;;  %340 = vst [vmem:[%s1003_s11 + $0x60] sm:$0xff] %v848_v12  ;;  %342 = vst [vmem:[%s1003_s11 + $0x68] sm:$0xff] %v849_v13  ;;  %v851_v15 = vld [vmem:[%s998_s10 + $0xf8] sm:$0xff] }
  0x19   : > { %344 = vst [vmem:[%s1003_s11 + $0x70] sm:$0xff] %v850_v14  ;;  %v852_v16 = vld [vmem:[%s998_s10 + $0x108] sm:$0xff]  ;;  %v853_v17 = vld [vmem:[%s998_s10 + $0x118] sm:$0xff]  ;;  %346 = vst [vmem:[%s1003_s11 + $0x78] sm:$0xff] %v851_v15 }
  0x1a   : > { %348 = vst [vmem:[%s1003_s11 + $0x80] sm:$0xff] %v852_v16  ;;  %350 = vst [vmem:[%s1003_s11 + $0x88] sm:$0xff] %v853_v17  ;;  %v854_v18 = vld [vmem:[%s998_s10 + $0x128] sm:$0xff]  ;;  %v855_v19 = vld [vmem:[%s998_s10 + $0x138] sm:$0xff] }
  0x1b   : > { %v856_v20 = vld [vmem:[%s998_s10 + $0x148] sm:$0xff]  ;;  %352 = vst [vmem:[%s1003_s11 + $0x90] sm:$0xff] %v854_v18  ;;  %354 = vst [vmem:[%s1003_s11 + $0x98] sm:$0xff] %v855_v19  ;;  %v857_v21 = vld [vmem:[%s998_s10 + $0x158] sm:$0xff] }
  0x1c   : > { %356 = vst [vmem:[%s1003_s11 + $0xa0] sm:$0xff] %v856_v20  ;;  %v858_v22 = vld [vmem:[%s998_s10 + $0x168] sm:$0xff]  ;;  %v859_v23 = vld [vmem:[%s998_s10 + $0x178] sm:$0xff]  ;;  %358 = vst [vmem:[%s1003_s11 + $0xa8] sm:$0xff] %v857_v21 }
  0x1d   : > { %360 = vst [vmem:[%s1003_s11 + $0xb0] sm:$0xff] %v858_v22  ;;  %362 = vst [vmem:[%s1003_s11 + $0xb8] sm:$0xff] %v859_v23  ;;  %v860_v24 = vld [vmem:[%s998_s10 + $0x188] sm:$0xff]  ;;  %v861_v25 = vld [vmem:[%s998_s10 + $0x198] sm:$0xff] }
  0x1e   : > { %v862_v26 = vld [vmem:[%s998_s10 + $0x1a8] sm:$0xff]  ;;  %364 = vst [vmem:[%s1003_s11 + $0xc0] sm:$0xff] %v860_v24  ;;  %366 = vst [vmem:[%s1003_s11 + $0xc8] sm:$0xff] %v861_v25  ;;  %v863_v27 = vld [vmem:[%s998_s10 + $0x1b8] sm:$0xff] }
  0x1f   : > { %368 = vst [vmem:[%s1003_s11 + $0xd0] sm:$0xff] %v862_v26  ;;  %v864_v28 = vld [vmem:[%s998_s10 + $0x1c8] sm:$0xff]  ;;  %v865_v29 = vld [vmem:[%s998_s10 + $0x1d8] sm:$0xff]  ;;  %370 = vst [vmem:[%s1003_s11 + $0xd8] sm:$0xff] %v863_v27 }
  0x20   : > { %372 = vst [vmem:[%s1003_s11 + $0xe0] sm:$0xff] %v864_v28  ;;  %374 = vst [vmem:[%s1003_s11 + $0xe8] sm:$0xff] %v865_v29  ;;  %v866_v30 = vld [vmem:[%s998_s10 + $0x1e8] sm:$0xff]  ;;  %v867_v31 = vld [vmem:[%s998_s10 + $0x1f8] sm:$0xff] }
  0x21   : > { %376 = vst [vmem:[%s1003_s11 + $0xf0] sm:$0xff] %v866_v30  ;;  %378 = vst [vmem:[%s1003_s11 + $0xf8] sm:$0xff] %v867_v31 }
  0x22 PF: > { %p868_p5 = scmp.ge.s32.totalorder %s927_s23, 1  ;;  %p383_p6 = scmp.lt.s32.totalorder %s927_s23, 3 }
  0x24   : > { %p384_p7 = pnand %p868_p5, %p383_p6 }
  0x25   : > { %s390_s12 = sand.u32 (!%p384_p7), 1, %s919_s21   ;;  %s870_s13 = sshll.u32 (!%p384_p7), %s829_s24, 5  ;;  %v1074_v32 = vld [vmem:[%s1348_s4] ss:$0 sm:$0xff] (!%p384_p7) }
  0x26   : > { %387 = sbr.rel (%p384_p7) target bundleno = 99 (0x63), region = 78  ;;  %s869_s14 = sshll.u32 (!%p384_p7), %s390_s12, 8  ;;  %v1079_v33 = vld [vmem:[%s1349_s5] ss:$0 sm:$0xff] (!%p384_p7) }
  0x27   : > { %p425_p8 = scmp.lt.s32.totalorder (!%p384_p7), %s870_s13, 63  ;;  %s1083_s19 = scalar_lea.vmem (!%p384_p7), [#allocation2], %s869_s14  ;;  %v1098_v43 = vld [vmem:[%s1345_s1] ss:$0 sm:$0xff] (!%p384_p7) }
  0x28   : > { %v547_v34 = vld [vmem:[%s1083_s19] sm:$0xff] (!%p384_p7)  ;;  %v548_v35 = vld [vmem:[%s1083_s19 + $0x8] sm:$0xff] (!%p384_p7)  ;;  %v549_v36 = vld [vmem:[%s1083_s19 + $0x10] sm:$0xff] (!%p384_p7) }
  0x29   : > { %v586_v37 = vmul.f32 (!%p384_p7), %v1074_v32, %v547_v34  ;;  %v587_v38 = vmul.f32 (!%p384_p7), %v1074_v32, %v548_v35  ;;  %v588_v39 = vmul.f32 (!%p384_p7), %v1074_v32, %v549_v36  ;;  %v550_v40 = vld [vmem:[%s1083_s19 + $0x18] sm:$0xff] (!%p384_p7)  ;;  %v551_v41 = vld [vmem:[%s1083_s19 + $0x20] sm:$0xff] (!%p384_p7)  ;;  %v552_v42 = vld [vmem:[%s1083_s19 + $0x28] sm:$0xff] (!%p384_p7) }
  0x2a   : > { %v589_v44 = vmul.f32 (!%p384_p7), %v1074_v32, %v550_v40  ;;  %v590_v45 = vmul.f32 (!%p384_p7), %v1074_v32, %v551_v41  ;;  %v591_v46 = vmul.f32 (!%p384_p7), %v1074_v32, %v552_v42  ;;  %v553_v47 = vld [vmem:[%s1083_s19 + $0x30] sm:$0xff] (!%p384_p7)  ;;  %v554_v48 = vld [vmem:[%s1083_s19 + $0x38] sm:$0xff] (!%p384_p7)  ;;  %v1115_v49 = vld [vmem:[%s1346_s2] ss:$0 sm:$0xff] (!%p384_p7) }
  0x2b   : > { %v625_v50 = vadd.f32 (!%p384_p7), %v1079_v33, %v586_v37  ;;  %v626_v51 = vadd.f32 (!%p384_p7), %v1079_v33, %v587_v38  ;;  %v627_v52 = vadd.f32 (!%p384_p7), %v1079_v33, %v588_v39  ;;  %v592_v53 = vmul.f32 (!%p384_p7), %v1074_v32, %v553_v47  ;;  %v555_v27 = vld [vmem:[%s1083_s19 + $0x40] sm:$0xff] (!%p384_p7)  ;;  %v556_v35 = vld [vmem:[%s1083_s19 + $0x48] sm:$0xff] (!%p384_p7)  ;;  %v557_v37 = vld [vmem:[%s1083_s19 + $0x50] sm:$0xff] (!%p384_p7) }
  0x2c   : > { %v628_v57 = vadd.f32 (!%p384_p7), %v1079_v33, %v589_v44  ;;  %v629_v58 = vadd.f32 (!%p384_p7), %v1079_v33, %v590_v45  ;;  %v630_v59 = vadd.f32 (!%p384_p7), %v1079_v33, %v591_v46  ;;  %v593_v60 = vmul.f32 (!%p384_p7), %v1074_v32, %v554_v48  ;;  %v558_v48 = vld [vmem:[%s1083_s19 + $0x58] sm:$0xff] (!%p384_p7) }
  0x2d   : > { %s1355_s13 = smov (!%p425_p8, %s870_s13), 63  ;;  %v631_v3 = vadd.f32 %v1079_v33, %v592_v53  ;;  %v594_v46 = vmul.f32 %v1074_v32, %v555_v27  ;;  %v596_v53 = vmul.f32 %v1074_v32, %v557_v37  ;;  %v563_v27 = vld [vmem:[%s1083_s19 + $0x80] sm:$0xff] }
  0x2e   : > { %s871_s20 = sshll.u32 %s1355_s13, 3  ;;  %v632_v9 = vadd.f32 %v1079_v33, %v593_v60 }
  0x2f   : > { %s1110_s27 = scalar_lea.vmem %s1344_s0, %s871_s20  ;;  %s1155_s9 = scalar_lea.vmem %s1350_s6, %s871_s20 }
  0x30   : > { %v437_v54 = vld [vmem:[%s1110_s27] sm:$0xff]  ;;  %v438_v55 = vld [vmem:[%s1110_s27 + $0x8] sm:$0xff]  ;;  %v439_v56 = vld [vmem:[%s1110_s27 + $0x10] sm:$0xff] }
  0x31   : > { %v476_v61 = vmul.f32 %v1098_v43, %v437_v54  ;;  %v477_v62 = vmul.f32 %v1098_v43, %v438_v55  ;;  %v478_v63 = vmul.f32 %v1098_v43, %v439_v56  ;;  %v440_v0 = vld [vmem:[%s1110_s27 + $0x18] sm:$0xff]  ;;  %v441_v1 = vld [vmem:[%s1110_s27 + $0x20] sm:$0xff]  ;;  %v442_v2 = vld [vmem:[%s1110_s27 + $0x28] sm:$0xff] }
  0x32   : > { %v479_v4 = vmul.f32 %v1098_v43, %v440_v0  ;;  %v480_v5 = vmul.f32 %v1098_v43, %v441_v1  ;;  %v481_v6 = vmul.f32 %v1098_v43, %v442_v2  ;;  %v443_v7 = vld [vmem:[%s1110_s27 + $0x30] sm:$0xff]  ;;  %v444_v8 = vld [vmem:[%s1110_s27 + $0x38] sm:$0xff]  ;;  %v445_v26 = vld [vmem:[%s1110_s27 + $0x40] sm:$0xff]  ;;  %v597_v0 = vmul.f32 %v1074_v32, %v558_v48 }
  0x33   : > { %v515_v10 = vadd.f32 %v1115_v49, %v476_v61  ;;  %v516_v11 = vadd.f32 %v1115_v49, %v477_v62  ;;  %v517_v12 = vadd.f32 %v1115_v49, %v478_v63  ;;  %v482_v13 = vmul.f32 %v1098_v43, %v443_v7  ;;  %v446_v28 = vld [vmem:[%s1110_s27 + $0x48] sm:$0xff]  ;;  %v447_v36 = vld [vmem:[%s1110_s27 + $0x50] sm:$0xff]  ;;  %v448_v42 = vld [vmem:[%s1110_s27 + $0x58] sm:$0xff] }
  0x34   : > { %v518_v14 = vadd.f32 %v1115_v49, %v479_v4  ;;  %v519_v15 = vadd.f32 %v1115_v49, %v480_v5  ;;  %v520_v16 = vadd.f32 %v1115_v49, %v481_v6  ;;  %v483_v17 = vmul.f32 %v1098_v43, %v444_v8  ;;  %v449_v54 = vld [vmem:[%s1110_s27 + $0x60] sm:$0xff]  ;;  %v450_v60 = vld [vmem:[%s1110_s27 + $0x68] sm:$0xff] }
  0x35   : > { %v657_v18 = vadd.f32 %v625_v50, %v515_v10  ;;  %v658_v19 = vadd.f32 %v626_v51, %v516_v11  ;;  %v659_v20 = vadd.f32 %v627_v52, %v517_v12  ;;  %v521_v21 = vadd.f32 %v1115_v49, %v482_v13  ;;  %v559_v55 = vld [vmem:[%s1083_s19 + $0x60] sm:$0xff]  ;;  %v560_v1 = vld [vmem:[%s1083_s19 + $0x68] sm:$0xff]  ;;  %v451_v10 = vld [vmem:[%s1110_s27 + $0x70] sm:$0xff] }
  0x36   : > { %v660_v22 = vadd.f32 %v628_v57, %v518_v14  ;;  %v661_v23 = vadd.f32 %v629_v58, %v519_v15  ;;  %v662_v24 = vadd.f32 %v630_v59, %v520_v16  ;;  %v522_v25 = vadd.f32 %v1115_v49, %v483_v17  ;;  %v561_v11 = vld [vmem:[%s1083_s19 + $0x70] sm:$0xff]  ;;  %v452_v16 = vld [vmem:[%s1110_s27 + $0x78] sm:$0xff] }
  0x37   : > { %v689_v29 = vmax.f32 %v657_v18, 0.0  ;;  %v690_v30 = vmax.f32 %v658_v19, 0.0  ;;  %v691_v31 = vmax.f32 %v659_v20, 0.0  ;;  %v663_v34 = vadd.f32 %v631_v3, %v521_v21  ;;  %v562_v17 = vld [vmem:[%s1083_s19 + $0x78] sm:$0xff]  ;;  %v453_v18 = vld [vmem:[%s1110_s27 + $0x80] sm:$0xff] }
  0x38   : > { %v692_v38 = vmax.f32 %v660_v22, 0.0  ;;  %v693_v39 = vmax.f32 %v661_v23, 0.0  ;;  %v694_v40 = vmax.f32 %v662_v24, 0.0  ;;  %v664_v41 = vadd.f32 %v632_v9, %v522_v25 }
  0x39   : > { %721 = vst [vmem:[%s1155_s9] sm:$0xff] %v689_v29  ;;  %722 = vst [vmem:[%s1155_s9 + $0x8] sm:$0xff] %v690_v30  ;;  %v695_v44 = vmax.f32 %v663_v34, 0.0  ;;  %v484_v45 = vmul.f32 %v1098_v43, %v445_v26  ;;  %v485_v47 = vmul.f32 %v1098_v43, %v446_v28  ;;  %v595_v51 = vmul.f32 %v1074_v32, %v556_v35  ;;  %v454_v34 = vld [vmem:[%s1110_s27 + $0x88] sm:$0xff] }
  0x3a   : > { %723 = vst [vmem:[%s1155_s9 + $0x10] sm:$0xff] %v691_v31  ;;  %724 = vst [vmem:[%s1155_s9 + $0x18] sm:$0xff] %v692_v38  ;;  %v696_v50 = vmax.f32 %v664_v41, 0.0  ;;  %v486_v52 = vmul.f32 %v1098_v43, %v447_v36  ;;  %v633_v57 = vadd.f32 %v1079_v33, %v594_v46  ;;  %v487_v59 = vmul.f32 %v1098_v43, %v448_v42  ;;  %v564_v35 = vld [vmem:[%s1083_s19 + $0x88] sm:$0xff]  ;;  %v565_v41 = vld [vmem:[%s1083_s19 + $0x90] sm:$0xff] }
  0x3b   : > { %725 = vst [vmem:[%s1155_s9 + $0x20] sm:$0xff] %v693_v39  ;;  %726 = vst [vmem:[%s1155_s9 + $0x28] sm:$0xff] %v694_v40  ;;  %v523_v56 = vadd.f32 %v1115_v49, %v484_v45  ;;  %v524_v58 = vadd.f32 %v1115_v49, %v485_v47  ;;  %v634_v61 = vadd.f32 %v1079_v33, %v595_v51  ;;  %v455_v40 = vld [vmem:[%s1110_s27 + $0x90] sm:$0xff]  ;;  %v456_v47 = vld [vmem:[%s1110_s27 + $0x98] sm:$0xff] }
  0x3c   : > { %727 = vst [vmem:[%s1155_s9 + $0x30] sm:$0xff] %v695_v44  ;;  %728 = vst [vmem:[%s1155_s9 + $0x38] sm:$0xff] %v696_v50  ;;  %v525_v62 = vadd.f32 %v1115_v49, %v486_v52  ;;  %v635_v63 = vadd.f32 %v1079_v33, %v596_v53  ;;  %v526_v3 = vadd.f32 %v1115_v49, %v487_v59 }
  0x3d   : > { %v665_v2 = vadd.f32 %v633_v57, %v523_v56  ;;  %v488_v4 = vmul.f32 %v1098_v43, %v449_v54  ;;  %v598_v5 = vmul.f32 %v1074_v32, %v559_v55  ;;  %v666_v6 = vadd.f32 %v634_v61, %v524_v58  ;;  %v566_v57 = vld [vmem:[%s1083_s19 + $0x98] sm:$0xff]  ;;  %v457_v58 = vld [vmem:[%s1110_s27 + $0xa0] sm:$0xff] }
  0x3e   : > { %v667_v7 = vadd.f32 %v635_v63, %v525_v62  ;;  %v636_v8 = vadd.f32 %v1079_v33, %v597_v0  ;;  %v489_v9 = vmul.f32 %v1098_v43, %v450_v60  ;;  %v599_v15 = vmul.f32 %v1074_v32, %v560_v1  ;;  %v567_v63 = vld [vmem:[%s1083_s19 + $0xa0] sm:$0xff]  ;;  %v458_v0 = vld [vmem:[%s1110_s27 + $0xa8] sm:$0xff] }
  0x3f   : > { %v697_v12 = vmax.f32 %v665_v2, 0.0  ;;  %v527_v13 = vadd.f32 %v1115_v49, %v488_v4  ;;  %v637_v14 = vadd.f32 %v1079_v33, %v598_v5  ;;  %v698_v19 = vmax.f32 %v666_v6, 0.0  ;;  %v568_v5 = vld [vmem:[%s1083_s19 + $0xa8] sm:$0xff] }
  0x40   : > { %v699_v20 = vmax.f32 %v667_v7, 0.0  ;;  %v668_v21 = vadd.f32 %v636_v8, %v526_v3  ;;  %v528_v22 = vadd.f32 %v1115_v49, %v489_v9  ;;  %v638_v24 = vadd.f32 %v1079_v33, %v599_v15  ;;  %v569_v15 = vld [vmem:[%s1083_s19 + $0xb0] sm:$0xff] }
  0x41   : > { %729 = vst [vmem:[%s1155_s9 + $0x40] sm:$0xff] %v697_v12  ;;  %v669_v23 = vadd.f32 %v637_v14, %v527_v13  ;;  %v490_v25 = vmul.f32 %v1098_v43, %v451_v10  ;;  %v600_v26 = vmul.f32 %v1074_v32, %v561_v11  ;;  %730 = vst [vmem:[%s1155_s9 + $0x48] sm:$0xff] %v698_v19  ;;  %v459_v10 = vld [vmem:[%s1110_s27 + $0xb0] sm:$0xff] }
  0x42   : > { %731 = vst [vmem:[%s1155_s9 + $0x50] sm:$0xff] %v699_v20  ;;  %v700_v28 = vmax.f32 %v668_v21, 0.0  ;;  %v491_v29 = vmul.f32 %v1098_v43, %v452_v16  ;;  %v601_v30 = vmul.f32 %v1074_v32, %v562_v17  ;;  %v492_v31 = vmul.f32 %v1098_v43, %v453_v18  ;;  %v460_v16 = vld [vmem:[%s1110_s27 + $0xb8] sm:$0xff] }
  0x43   : > { %v701_v36 = vmax.f32 %v669_v23, 0.0  ;;  %v670_v37 = vadd.f32 %v638_v24, %v528_v22  ;;  %v529_v38 = vadd.f32 %v1115_v49, %v490_v25  ;;  %v639_v39 = vadd.f32 %v1079_v33, %v600_v26  ;;  %v570_v21 = vld [vmem:[%s1083_s19 + $0xb8] sm:$0xff]  ;;  %v461_v22 = vld [vmem:[%s1110_s27 + $0xc0] sm:$0xff] }
  0x44   : > { %732 = vst [vmem:[%s1155_s9 + $0x58] sm:$0xff] %v700_v28  ;;  %v530_v42 = vadd.f32 %v1115_v49, %v491_v29  ;;  %v640_v44 = vadd.f32 %v1079_v33, %v601_v30  ;;  %v531_v45 = vadd.f32 %v1115_v49, %v492_v31  ;;  %v602_v46 = vmul.f32 %v1074_v32, %v563_v27  ;;  %v571_v31 = vld [vmem:[%s1083_s19 + $0xc0] sm:$0xff] }
  0x45   : > { %733 = vst [vmem:[%s1155_s9 + $0x60] sm:$0xff] %v701_v36  ;;  %v702_v48 = vmax.f32 %v670_v37, 0.0  ;;  %v671_v50 = vadd.f32 %v639_v39, %v529_v38  ;;  %v493_v51 = vmul.f32 %v1098_v43, %v454_v34  ;;  %v603_v52 = vmul.f32 %v1074_v32, %v564_v35  ;;  %v462_v38 = vld [vmem:[%s1110_s27 + $0xc8] sm:$0xff] }
  0x46   : > { %v672_v53 = vadd.f32 %v640_v44, %v530_v42  ;;  %v641_v54 = vadd.f32 %v1079_v33, %v602_v46  ;;  %v494_v55 = vmul.f32 %v1098_v43, %v455_v40  ;;  %v604_v56 = vmul.f32 %v1074_v32, %v565_v41  ;;  %v572_v39 = vld [vmem:[%s1083_s19 + $0xc8] sm:$0xff]  ;;  %v573_v46 = vld [vmem:[%s1083_s19 + $0xd0] sm:$0xff] }
  0x47   : > { %734 = vst [vmem:[%s1155_s9 + $0x68] sm:$0xff] %v702_v48  ;;  %v703_v59 = vmax.f32 %v671_v50, 0.0  ;;  %v532_v60 = vadd.f32 %v1115_v49, %v493_v51  ;;  %v642_v61 = vadd.f32 %v1079_v33, %v603_v52  ;;  %v495_v62 = vmul.f32 %v1098_v43, %v456_v47  ;;  %v464_v52 = vld [vmem:[%s1110_s27 + $0xd8] sm:$0xff] }
  0x48   : > { %v704_v1 = vmax.f32 %v672_v53, 0.0  ;;  %v673_v2 = vadd.f32 %v641_v54, %v531_v45  ;;  %v533_v3 = vadd.f32 %v1115_v49, %v494_v55  ;;  %v643_v4 = vadd.f32 %v1079_v33, %v604_v56  ;;  %v463_v45 = vld [vmem:[%s1110_s27 + $0xd0] sm:$0xff] }
  0x49   : > { %735 = vst [vmem:[%s1155_s9 + $0x70] sm:$0xff] %v703_v59  ;;  %v674_v6 = vadd.f32 %v642_v61, %v532_v60  ;;  %v534_v7 = vadd.f32 %v1115_v49, %v495_v62  ;;  %v605_v8 = vmul.f32 %v1074_v32, %v566_v57  ;;  %v496_v9 = vmul.f32 %v1098_v43, %v457_v58  ;;  %v574_v61 = vld [vmem:[%s1083_s19 + $0xd8] sm:$0xff]  ;;  %v465_v62 = vld [vmem:[%s1110_s27 + $0xe0] sm:$0xff] }
  0x4a   : > { %736 = vst [vmem:[%s1155_s9 + $0x78] sm:$0xff] %v704_v1  ;;  %v705_v11 = vmax.f32 %v673_v2, 0.0  ;;  %v675_v12 = vadd.f32 %v643_v4, %v533_v3  ;;  %v606_v13 = vmul.f32 %v1074_v32, %v567_v63  ;;  %v497_v14 = vmul.f32 %v1098_v43, %v458_v0  ;;  %v575_v3 = vld [vmem:[%s1083_s19 + $0xe0] sm:$0xff]  ;;  %v466_v4 = vld [vmem:[%s1110_s27 + $0xe8] sm:$0xff] }
  0x4b   : > { %v706_v17 = vmax.f32 %v674_v6, 0.0  ;;  %v644_v18 = vadd.f32 %v1079_v33, %v605_v8  ;;  %v535_v19 = vadd.f32 %v1115_v49, %v496_v9  ;;  %v607_v20 = vmul.f32 %v1074_v32, %v568_v5  ;;  %v576_v9 = vld [vmem:[%s1083_s19 + $0xe8] sm:$0xff] }
  0x4c   : > { %737 = vst [vmem:[%s1155_s9 + $0x80] sm:$0xff] %v705_v11  ;;  %v707_v23 = vmax.f32 %v675_v12, 0.0  ;;  %v645_v24 = vadd.f32 %v1079_v33, %v606_v13  ;;  %v536_v25 = vadd.f32 %v1115_v49, %v497_v14  ;;  %v498_v26 = vmul.f32 %v1098_v43, %v459_v10  ;;  %v467_v14 = vld [vmem:[%s1110_s27 + $0xf0] sm:$0xff] }
  0x4d   : > { %738 = vst [vmem:[%s1155_s9 + $0x88] sm:$0xff] %v706_v17  ;;  %v676_v27 = vadd.f32 %v644_v18, %v534_v7  ;;  %v646_v28 = vadd.f32 %v1079_v33, %v607_v20  ;;  %v608_v29 = vmul.f32 %v1074_v32, %v569_v15  ;;  %v499_v30 = vmul.f32 %v1098_v43, %v460_v16  ;;  %v468_v20 = vld [vmem:[%s1110_s27 + $0xf8] sm:$0xff] }
  0x4e   : > { %739 = vst [vmem:[%s1155_s9 + $0x90] sm:$0xff] %v707_v23  ;;  %v677_v34 = vadd.f32 %v645_v24, %v535_v19  ;;  %v537_v35 = vadd.f32 %v1115_v49, %v498_v26  ;;  %v609_v36 = vmul.f32 %v1074_v32, %v570_v21  ;;  %v500_v37 = vmul.f32 %v1098_v43, %v461_v22  ;;  %v577_v19 = vld [vmem:[%s1083_s19 + $0xf0] sm:$0xff] }
  0x4f   : > { %v708_v40 = vmax.f32 %v676_v27, 0.0  ;;  %v678_v41 = vadd.f32 %v646_v28, %v536_v25  ;;  %v647_v42 = vadd.f32 %v1079_v33, %v608_v29  ;;  %v538_v44 = vadd.f32 %v1115_v49, %v499_v30  ;;  %v578_v25 = vld [vmem:[%s1083_s19 + $0xf8] sm:$0xff] }
  0x50   : > { %v709_v47 = vmax.f32 %v677_v34, 0.0  ;;  %v648_v48 = vadd.f32 %v1079_v33, %v609_v36  ;;  %v539_v50 = vadd.f32 %v1115_v49, %v500_v37  ;;  %v610_v51 = vmul.f32 %v1074_v32, %v571_v31 }
  0x51   : > { %740 = vst [vmem:[%s1155_s9 + $0x98] sm:$0xff] %v708_v40  ;;  %v710_v53 = vmax.f32 %v678_v41, 0.0  ;;  %v679_v54 = vadd.f32 %v647_v42, %v537_v35  ;;  %v501_v55 = vmul.f32 %v1098_v43, %v462_v38  ;;  %v611_v56 = vmul.f32 %v1074_v32, %v572_v39 }
  0x52   : > { %741 = vst [vmem:[%s1155_s9 + $0xa0] sm:$0xff] %v709_v47  ;;  %v680_v57 = vadd.f32 %v648_v48, %v538_v44  ;;  %v649_v58 = vadd.f32 %v1079_v33, %v610_v51  ;;  %v502_v59 = vmul.f32 %v1098_v43, %v463_v45  ;;  %v612_v60 = vmul.f32 %v1074_v32, %v573_v46 }
  0x53   : > { %742 = vst [vmem:[%s1155_s9 + $0xa8] sm:$0xff] %v710_v53  ;;  %v711_v63 = vmax.f32 %v679_v54, 0.0  ;;  %v540_v0 = vadd.f32 %v1115_v49, %v501_v55  ;;  %v650_v1 = vadd.f32 %v1079_v33, %v611_v56  ;;  %v503_v2 = vmul.f32 %v1098_v43, %v464_v52 }
  0x54   : > { %v712_v5 = vmax.f32 %v680_v57, 0.0  ;;  %v681_v6 = vadd.f32 %v649_v58, %v539_v50  ;;  %v541_v7 = vadd.f32 %v1115_v49, %v502_v59  ;;  %v651_v8 = vadd.f32 %v1079_v33, %v612_v60 }
  0x55   : > { %743 = vst [vmem:[%s1155_s9 + $0xb0] sm:$0xff] %v711_v63  ;;  %v682_v10 = vadd.f32 %v650_v1, %v540_v0  ;;  %v542_v11 = vadd.f32 %v1115_v49, %v503_v2  ;;  %v613_v12 = vmul.f32 %v1074_v32, %v574_v61  ;;  %v504_v13 = vmul.f32 %v1098_v43, %v465_v62 }
  0x56   : > { %744 = vst [vmem:[%s1155_s9 + $0xb8] sm:$0xff] %v712_v5  ;;  %v713_v15 = vmax.f32 %v681_v6, 0.0  ;;  %v683_v16 = vadd.f32 %v651_v8, %v541_v7  ;;  %v614_v17 = vmul.f32 %v1074_v32, %v575_v3  ;;  %v505_v18 = vmul.f32 %v1098_v43, %v466_v4 }
  0x57   : > { %v714_v21 = vmax.f32 %v682_v10, 0.0  ;;  %v652_v22 = vadd.f32 %v1079_v33, %v613_v12  ;;  %v543_v23 = vadd.f32 %v1115_v49, %v504_v13  ;;  %v615_v24 = vmul.f32 %v1074_v32, %v576_v9 }
  0x58   : > { %745 = vst [vmem:[%s1155_s9 + $0xc0] sm:$0xff] %v713_v15  ;;  %v715_v26 = vmax.f32 %v683_v16, 0.0  ;;  %v653_v27 = vadd.f32 %v1079_v33, %v614_v17  ;;  %v544_v28 = vadd.f32 %v1115_v49, %v505_v18  ;;  %v506_v29 = vmul.f32 %v1098_v43, %v467_v14 }
  0x59   : > { %746 = vst [vmem:[%s1155_s9 + $0xc8] sm:$0xff] %v714_v21  ;;  %v684_v30 = vadd.f32 %v652_v22, %v542_v11  ;;  %v654_v31 = vadd.f32 %v1079_v33, %v615_v24  ;;  %v616_v34 = vmul.f32 %v1074_v32, %v577_v19  ;;  %v507_v35 = vmul.f32 %v1098_v43, %v468_v20 }
  0x5a   : > { %747 = vst [vmem:[%s1155_s9 + $0xd0] sm:$0xff] %v715_v26  ;;  %v685_v36 = vadd.f32 %v653_v27, %v543_v23  ;;  %v545_v37 = vadd.f32 %v1115_v49, %v506_v29  ;;  %v617_v38 = vmul.f32 %v1074_v32, %v578_v25 }
  0x5b   : > { %v716_v39 = vmax.f32 %v684_v30, 0.0  ;;  %v686_v40 = vadd.f32 %v654_v31, %v544_v28  ;;  %v655_v41 = vadd.f32 %v1079_v33, %v616_v34  ;;  %v546_v42 = vadd.f32 %v1115_v49, %v507_v35 }
  0x5c   : > { %v717_v44 = vmax.f32 %v685_v36, 0.0  ;;  %v656_v45 = vadd.f32 %v1079_v33, %v617_v38 }
  0x5d   : > { %748 = vst [vmem:[%s1155_s9 + $0xd8] sm:$0xff] %v716_v39  ;;  %v718_v43 = vmax.f32 %v686_v40, 0.0  ;;  %v687_v46 = vadd.f32 %v655_v41, %v545_v37 }
  0x5e   : > { %749 = vst [vmem:[%s1155_s9 + $0xe0] sm:$0xff] %v717_v44  ;;  %v688_v47 = vadd.f32 %v656_v45, %v546_v42 }
  0x5f   : > { %750 = vst [vmem:[%s1155_s9 + $0xe8] sm:$0xff] %v718_v43  ;;  %v719_v48 = vmax.f32 %v687_v46, 0.0 }
  0x60   : > { %v720_v50 = vmax.f32 %v688_v47, 0.0 }
  0x61   : > { %751 = vst [vmem:[%s1155_s9 + $0xf0] sm:$0xff] %v719_v48 }
  0x62   : > { %752 = vst [vmem:[%s1155_s9 + $0xf8] sm:$0xff] %v720_v50 }
  0x63 PF: > { %p13_p9 = scmp.ge.s32.totalorder %s981_s25, 4   ;;  %s1351_s21 = smov %s923_s22 }
  0x64   : > { %s1352_s22 = smov %s990_s28  ;;  %s1353_s23 = smov %s981_s25 }
  0x65   :  { %15 = sbr.rel (!%p13_p9) target bundleno = 2 (0x2), region = 120 }

// kernel: channel_compression_forward.6
= control target key start
LH: loop header
LB: loop body
LE: loop exit
PB: predicated region body
PF: predicated region fallthrough
CT: control target
= control target key end

     0   :  { %s923_s12 = smov 0   ;;  %s1171_s0 = inlined_call_operand.vmem [shape: bf16[512,128], index: 0, kind: input, shape index: {}]   ;;  %s1172_s1 = inlined_call_operand.vmem [shape: bf16[128,128], index: 1, kind: input, shape index: {}]   ;;  %s1173_s2 = inlined_call_operand.vmem [shape: f32[512,128], index: 2, kind: output, shape index: {0}]   ;;  %s1174_s3 = inlined_call_operand.vmem [shape: f32[8,128], index: 3, kind: output, shape index: {1}]  }
   0x1 LB: > { %s737_s13 = sadd.s32 4294967295, %s900_s12   ;;  %p741_p0 = scmp.ge.s32.totalorder %s900_s12, 1  ;;  %s900_s12 = sphi %s923_s12, %s14_s12  }
   0x2   : > { %p136_p1 = scmp.lt.s32.totalorder %s900_s12, 3 }
   0x4   : > { %p137_p2 = pnand %p741_p0, %p136_p1 }
   0x5   : > { %v870_v0 = vld [vmem:[%s1172_s1] sm:$0xff] (!%p137_p2)   ;;  %s742_s16 = sshll.u32 (!%p137_p2), %s737_s13, 5  ;;  %v871_v1 = vld [vmem:[%s1172_s1 + $0x8] sm:$0xff] (!%p137_p2)   ;;  %v872_v2 = vld [vmem:[%s1172_s1 + $0x10] sm:$0xff] (!%p137_p2)   ;;  %p770_p4 = scmp.ne.s32.totalorder (!%p137_p2), %s737_s13, 0 }
   0x6   : > { %140 = sbr.rel (%p137_p2) target bundleno = 357 (0x165), region = 28  ;;  %p161_p3 = scmp.lt.s32.totalorder (!%p137_p2), %s742_s16, 63  ;;  %797 = vmatprep.subr.bf16.mxu0 (!%p137_p2), %v870_v0  ;;  %845 = vmatprep.subr.bf16.mxu1 (!%p137_p2), %v870_v0  ;;  %v873_v3 = vld [vmem:[%s1172_s1 + $0x18] sm:$0xff] (!%p137_p2)   ;;  %v874_v6 = vld [vmem:[%s1172_s1 + $0x20] sm:$0xff] (!%p137_p2)   ;;  %v875_v7 = vld [vmem:[%s1172_s1 + $0x28] sm:$0xff] (!%p137_p2)  }
   0x7   : > { %798 = vmatpush3.bf16.msra.mxu0 (!%p137_p2), %v870_v0  ;;  %853 = vmatpush3.bf16.msra.mxu1 (!%p137_p2), %v870_v0  ;;  %v876_v8 = vld [vmem:[%s1172_s1 + $0x30] sm:$0xff] (!%p137_p2)   ;;  %v877_v9 = vld [vmem:[%s1172_s1 + $0x38] sm:$0xff] (!%p137_p2)  }
   0x8   : > { %799 = vmatprep.subr.bf16.mxu0 (!%p137_p2), %v871_v1  ;;  %846 = vmatprep.subr.bf16.mxu1 (!%p137_p2), %v871_v1 }
   0xb   : > { %800 = vmatpush3.bf16.msra.mxu0 (!%p137_p2), %v871_v1  ;;  %854 = vmatpush3.bf16.msra.mxu1 (!%p137_p2), %v871_v1 }
   0xc   : > { %801 = vmatprep.subr.bf16.mxu0 (!%p137_p2), %v872_v2  ;;  %847 = vmatprep.subr.bf16.mxu1 (!%p137_p2), %v872_v2 }
   0xd   : > { %s1176_s16 = smov (!%p161_p3, %s742_s16), 63  ;;  %v902_v56 = vmov (!%p770_p4), 0.0  }
   0xe   : > { %s743_s21 = sshll.u32 %s1176_s16, 2  ;;  %s745_s8 = sshll.u32 %s1176_s16, 3  ;;  %562 = vst [vmem:[%s1174_s3] sm:$0xff] (!%p770_p4), %v902_v56 }
   0xf   : > { %s948_s24 = scalar_lea.vmem %s1171_s0, %s743_s21  ;;  %802 = vmatpush3.bf16.msra.mxu0 %v872_v2  ;;  %855 = vmatpush3.bf16.msra.mxu1 %v872_v2  ;;  %s985_s11 = scalar_lea.vmem %s1173_s2, %s745_s8 }
  0x10   : > { %v878_v4 = vld [vmem:[%s948_s24] sm:$0xff]   ;;  %803 = vmatprep.subr.bf16.mxu0 %v873_v3  ;;  %848 = vmatprep.subr.bf16.mxu1 %v873_v3  ;;  %v880_v10 = vld [vmem:[%s948_s24 + $0x8] sm:$0xff]   ;;  %v882_v12 = vld [vmem:[%s948_s24 + $0x10] sm:$0xff]  }
  0x11   : > { %v879_v5 = vld [vmem:[%s948_s24 + $0x40] sm:$0xff]   ;;  %813 = vmatprep.mubr.bf16.mxu0 %v878_v4  ;;  %v881_v11 = vld [vmem:[%s948_s24 + $0x48] sm:$0xff]   ;;  %v883_v13 = vld [vmem:[%s948_s24 + $0x50] sm:$0xff]  }
  0x12   : > { %829 = vmatprep.mubr.bf16.mxu1 %v879_v5  ;;  %v884_v14 = vld [vmem:[%s948_s24 + $0x18] sm:$0xff]   ;;  %v886_v16 = vld [vmem:[%s948_s24 + $0x20] sm:$0xff]   ;;  %v888_v18 = vld [vmem:[%s948_s24 + $0x28] sm:$0xff]  }
  0x13   : > { %804 = vmatpush3.bf16.msra.mxu0 %v873_v3  ;;  %856 = vmatpush3.bf16.msra.mxu1 %v873_v3  ;;  %v885_v15 = vld [vmem:[%s948_s24 + $0x58] sm:$0xff]   ;;  %v887_v17 = vld [vmem:[%s948_s24 + $0x60] sm:$0xff]   ;;  %v889_v19 = vld [vmem:[%s948_s24 + $0x68] sm:$0xff]  }
  0x14   : > { %805 = vmatprep.subr.bf16.mxu0 %v874_v6  ;;  %849 = vmatprep.subr.bf16.mxu1 %v874_v6  ;;  %v890_v20 = vld [vmem:[%s948_s24 + $0x30] sm:$0xff]   ;;  %v892_v22 = vld [vmem:[%s948_s24 + $0x38] sm:$0xff]  }
  0x15   : > { %v891_v21 = vld [vmem:[%s948_s24 + $0x70] sm:$0xff]   ;;  %v893_v23 = vld [vmem:[%s948_s24 + $0x78] sm:$0xff]  }
  0x17   : > { %806 = vmatpush3.bf16.msra.mxu0 %v874_v6  ;;  %857 = vmatpush3.bf16.msra.mxu1 %v874_v6 }
  0x18   : > { %807 = vmatprep.subr.bf16.mxu0 %v875_v7  ;;  %850 = vmatprep.subr.bf16.mxu1 %v875_v7 }
  0x1b   : > { %808 = vmatpush3.bf16.msra.mxu0 %v875_v7  ;;  %858 = vmatpush3.bf16.msra.mxu1 %v875_v7 }
  0x1c   : > { %809 = vmatprep.subr.bf16.mxu0 %v876_v8  ;;  %851 = vmatprep.subr.bf16.mxu1 %v876_v8 }
  0x1f   : > { %810 = vmatpush3.bf16.msra.mxu0 %v876_v8  ;;  %859 = vmatpush3.bf16.msra.mxu1 %v876_v8 }
  0x20   : > { %811 = vmatprep.subr.bf16.mxu0 %v877_v9  ;;  %852 = vmatprep.subr.bf16.mxu1 %v877_v9 }
  0x23   : > { %812 = vmatpush3.bf16.msra.mxu0 %v877_v9  ;;  %860 = vmatpush3.bf16.msra.mxu1 %v877_v9 }
  0x26   : > { %814 = vmatmul.mubr.bf16.vlgmr.msra.gmra.mrb[0].mxu0 %v880_v10  ;;  %830 = vmatmul.mubr.bf16.vlgmr.msra.gmra.mrb[0].mxu1 %v881_v11 }
  0x27   : > { %817 = vmatprep.mubr.bf16.mxu0 %v882_v12  ;;  %833 = vmatprep.mubr.bf16.mxu1 %v883_v13 }
  0x2e   : > { %818 = vmatmul.mubr.bf16.gmra.mrb[4].mxu0 %v884_v14  ;;  %834 = vmatmul.mubr.bf16.gmra.mrb[4].mxu1 %v885_v15 }
  0x2f   : > { %821 = vmatprep.mubr.bf16.mxu0 %v886_v16  ;;  %837 = vmatprep.mubr.bf16.mxu1 %v887_v17 }
  0x36   : > { %822 = vmatmul.mubr.bf16.gmra.mrb[8].mxu0 %v888_v18  ;;  %838 = vmatmul.mubr.bf16.gmra.mrb[8].mxu1 %v889_v19 }
  0x37   : > { %825 = vmatprep.mubr.bf16.mxu0 %v890_v20  ;;  %841 = vmatprep.mubr.bf16.mxu1 %v891_v21 }
  0x3e   : > { %826 = vmatmul.mubr.bf16.gmra.mrb[12].mxu0 %v892_v22  ;;  %842 = vmatmul.mubr.bf16.gmra.mrb[12].mxu1 %v893_v23 }
  0xf9   : > { %v987_v24 = vpop.f32.mrb[0].mxu0  ;;  %v989_v25 = vpop.f32.mrb[0].mxu1 }
  0xfa   : > { %528 = vst [vmem:[%s985_s11 + $0x10] sm:$0xff] %v987_v24  ;;  %544 = vst [vmem:[%s985_s11 + $0x90] sm:$0xff] %v989_v25  ;;  %v995_v26 = vpop.f32.mrb[1].mxu0  ;;  %v997_v27 = vpop.f32.mrb[1].mxu1 }
  0xfb   : > { %526 = vst [vmem:[%s985_s11] sm:$0xff] %v995_v26  ;;  %542 = vst [vmem:[%s985_s11 + $0x80] sm:$0xff] %v997_v27  ;;  %v1003_v28 = vpop.f32.mrb[2].mxu0  ;;  %v1005_v29 = vpop.f32.mrb[2].mxu1 }
  0xfc   : > { %529 = vst [vmem:[%s985_s11 + $0x18] sm:$0xff] %v1003_v28  ;;  %545 = vst [vmem:[%s985_s11 + $0x98] sm:$0xff] %v1005_v29  ;;  %v402_v30 = vpop.f32.mrb[3].mxu0  ;;  %v1011_v31 = vpop.f32.mrb[3].mxu1 }
  0xfd   : > { %527 = vst [vmem:[%s985_s11 + $0x8] sm:$0xff] %v402_v30  ;;  %543 = vst [vmem:[%s985_s11 + $0x88] sm:$0xff] %v1011_v31 }
 0x101   : > { %v1016_v32 = vpop.f32.mrb[4].mxu0  ;;  %v1018_v33 = vpop.f32.mrb[4].mxu1 }
 0x102   : > { %532 = vst [vmem:[%s985_s11 + $0x30] sm:$0xff] %v1016_v32  ;;  %548 = vst [vmem:[%s985_s11 + $0xb0] sm:$0xff] %v1018_v33  ;;  %v415_v34 = vpop.f32.mrb[5].mxu0  ;;  %v1024_v35 = vpop.f32.mrb[5].mxu1 }
 0x103   : > { %530 = vst [vmem:[%s985_s11 + $0x20] sm:$0xff] %v415_v34  ;;  %546 = vst [vmem:[%s985_s11 + $0xa0] sm:$0xff] %v1024_v35  ;;  %v1029_v36 = vpop.f32.mrb[6].mxu0  ;;  %v1031_v37 = vpop.f32.mrb[6].mxu1 }
 0x104   : > { %533 = vst [vmem:[%s985_s11 + $0x38] sm:$0xff] %v1029_v36  ;;  %549 = vst [vmem:[%s985_s11 + $0xb8] sm:$0xff] %v1031_v37  ;;  %v418_v38 = vpop.f32.mrb[7].mxu0  ;;  %v1037_v39 = vpop.f32.mrb[7].mxu1 }
 0x105   : > { %531 = vst [vmem:[%s985_s11 + $0x28] sm:$0xff] %v418_v38  ;;  %547 = vst [vmem:[%s985_s11 + $0xa8] sm:$0xff] %v1037_v39 }
 0x109   : > { %v1042_v40 = vpop.f32.mrb[8].mxu0  ;;  %v1044_v41 = vpop.f32.mrb[8].mxu1 }
 0x10a   : > { %536 = vst [vmem:[%s985_s11 + $0x50] sm:$0xff] %v1042_v40  ;;  %552 = vst [vmem:[%s985_s11 + $0xd0] sm:$0xff] %v1044_v41  ;;  %v431_v42 = vpop.f32.mrb[9].mxu0  ;;  %v1050_v43 = vpop.f32.mrb[9].mxu1 }
 0x10b   : > { %534 = vst [vmem:[%s985_s11 + $0x40] sm:$0xff] %v431_v42  ;;  %550 = vst [vmem:[%s985_s11 + $0xc0] sm:$0xff] %v1050_v43  ;;  %v824_v44 = vpop.f32.mrb[10].mxu0  ;;  %v1055_v45 = vpop.f32.mrb[10].mxu1 }
 0x10c   : > { %537 = vst [vmem:[%s985_s11 + $0x58] sm:$0xff] %v824_v44  ;;  %553 = vst [vmem:[%s985_s11 + $0xd8] sm:$0xff] %v1055_v45  ;;  %v434_v46 = vpop.f32.mrb[11].mxu0  ;;  %v1060_v47 = vpop.f32.mrb[11].mxu1 }
 0x10d   : > { %535 = vst [vmem:[%s985_s11 + $0x48] sm:$0xff] %v434_v46  ;;  %551 = vst [vmem:[%s985_s11 + $0xc8] sm:$0xff] %v1060_v47 }
 0x10f   : > { %561 = sbr.rel (%p770_p4) target bundleno = 278 (0x116), region = 32 }
 0x111   : > { %v827_v48 = vpop.f32.mrb[12].mxu0  ;;  %v1065_v49 = vpop.f32.mrb[12].mxu1 }
 0x112   : > { %540 = vst [vmem:[%s985_s11 + $0x70] sm:$0xff] %v827_v48  ;;  %556 = vst [vmem:[%s985_s11 + $0xf0] sm:$0xff] %v1065_v49  ;;  %v447_v50 = vpop.f32.mrb[13].mxu0  ;;  %v1070_v51 = vpop.f32.mrb[13].mxu1 }
 0x113   : > { %538 = vst [vmem:[%s985_s11 + $0x60] sm:$0xff] %v447_v50  ;;  %554 = vst [vmem:[%s985_s11 + $0xe0] sm:$0xff] %v1070_v51  ;;  %v828_v52 = vpop.f32.mrb[14].mxu0  ;;  %v1075_v53 = vpop.f32.mrb[14].mxu1 }
 0x114   : > { %541 = vst [vmem:[%s985_s11 + $0x78] sm:$0xff] %v828_v52  ;;  %557 = vst [vmem:[%s985_s11 + $0xf8] sm:$0xff] %v1075_v53  ;;  %v450_v54 = vpop.f32.mrb[15].mxu0  ;;  %v1080_v55 = vpop.f32.mrb[15].mxu1 }
 0x115   : > { %539 = vst [vmem:[%s985_s11 + $0x68] sm:$0xff] %v450_v54  ;;  %555 = vst [vmem:[%s985_s11 + $0xe8] sm:$0xff] %v1080_v55 }
 0x116 PF: > { %v564_v57 = vadd.f32 %v402_v30, %v995_v26  ;;  %v604_v60 = vmul.f32 %v995_v26, %v995_v26  ;;  %v605_v61 = vmul.f32 %v402_v30, %v402_v30  ;;  %v606_v63 = vmul.f32 %v987_v24, %v987_v24 }
 0x117   : > { %v607_v1 = vmul.f32 %v1003_v28, %v1003_v28  ;;  %v608_v4 = vmul.f32 %v415_v34, %v415_v34  ;;  %v609_v7 = vmul.f32 %v418_v38, %v418_v38  ;;  %v610_v10 = vmul.f32 %v1016_v32, %v1016_v32 }
 0x118   : > { %v565_v58 = vadd.f32 %v987_v24, %v564_v57  ;;  %v636_v2 = vadd.f32 %v605_v61, %v604_v60  ;;  %v611_v13 = vmul.f32 %v1029_v36, %v1029_v36  ;;  %v612_v16 = vmul.f32 %v431_v42, %v431_v42 }
 0x119   : > { %v613_v19 = vmul.f32 %v434_v46, %v434_v46  ;;  %v614_v22 = vmul.f32 %v1042_v40, %v1042_v40  ;;  %v615_v26 = vmul.f32 %v824_v44, %v824_v44  ;;  %v618_v57 = vmul.f32 %v827_v48, %v827_v48 }
 0x11a   : > { %v566_v59 = vadd.f32 %v1003_v28, %v565_v58  ;;  %v637_v5 = vadd.f32 %v636_v2, %v606_v63 }
 0x11c   : > { %v567_v62 = vadd.f32 %v566_v59, %v415_v34  ;;  %v638_v8 = vadd.f32 %v637_v5, %v607_v1  ;;  %v619_v59 = vmul.f32 %v828_v52, %v828_v52  ;;  %v623_v1 = vmul.f32 %v1005_v29, %v1005_v29 }
 0x11d   : > { %v625_v5 = vmul.f32 %v1037_v39, %v1037_v39 }
 0x11e   : > { %v568_v0 = vadd.f32 %v567_v62, %v418_v38  ;;  %v639_v11 = vadd.f32 %v638_v8, %v608_v4  ;;  %v617_v38 = vmul.f32 %v450_v54, %v450_v54 }
 0x120   : > { %v569_v3 = vadd.f32 %v1016_v32, %v568_v0  ;;  %v640_v14 = vadd.f32 %v639_v11, %v609_v7  ;;  %v616_v32 = vmul.f32 %v447_v50, %v447_v50  ;;  %v626_v7 = vmul.f32 %v1018_v33, %v1018_v33 }
 0x121   : > { %v628_v11 = vmul.f32 %v1050_v43, %v1050_v43 }
 0x122   : > { %v570_v6 = vadd.f32 %v1029_v36, %v569_v3  ;;  %v641_v17 = vadd.f32 %v640_v14, %v610_v10  ;;  %v624_v3 = vmul.f32 %v1024_v35, %v1024_v35 }
 0x124   : > { %v571_v9 = vadd.f32 %v570_v6, %v431_v42  ;;  %v642_v20 = vadd.f32 %v641_v17, %v611_v13  ;;  %v629_v13 = vmul.f32 %v1060_v47, %v1060_v47  ;;  %v631_v17 = vmul.f32 %v1055_v45, %v1055_v45 }
 0x126   : > { %v572_v12 = vadd.f32 %v571_v9, %v434_v46  ;;  %v643_v23 = vadd.f32 %v642_v20, %v612_v16  ;;  %v627_v9 = vmul.f32 %v1031_v37, %v1031_v37 }
 0x128   : > { %v573_v15 = vadd.f32 %v1042_v40, %v572_v12  ;;  %v644_v28 = vadd.f32 %v643_v23, %v613_v19  ;;  %v632_v19 = vmul.f32 %v1070_v51, %v1070_v51  ;;  %v634_v23 = vmul.f32 %v1065_v49, %v1065_v49 }
 0x12a   : > { %v574_v18 = vadd.f32 %v824_v44, %v573_v15  ;;  %v645_v34 = vadd.f32 %v644_v28, %v614_v22  ;;  %v620_v44 = vmul.f32 %v997_v27, %v997_v27  ;;  %v630_v15 = vmul.f32 %v1044_v41, %v1044_v41 }
 0x12c   : > { %v575_v21 = vadd.f32 %v574_v18, %v447_v50  ;;  %v646_v56 = vadd.f32 %v645_v34, %v615_v26 }
 0x12e   : > { %v576_v24 = vadd.f32 %v575_v21, %v450_v54  ;;  %v647_v58 = vadd.f32 %v646_v56, %v616_v32  ;;  %v621_v54 = vmul.f32 %v1011_v31, %v1011_v31  ;;  %v633_v21 = vmul.f32 %v1080_v55, %v1080_v55 }
 0x130   : > { %v577_v30 = vadd.f32 %v827_v48, %v576_v24  ;;  %v648_v60 = vadd.f32 %v647_v58, %v617_v38  ;;  %v622_v48 = vmul.f32 %v989_v25, %v989_v25 }
 0x132   : > { %v578_v36 = vadd.f32 %v828_v52, %v577_v30  ;;  %v649_v61 = vadd.f32 %v648_v60, %v618_v57 }
 0x134   : > { %v579_v42 = vadd.f32 %v578_v36, %v997_v27  ;;  %v650_v62 = vadd.f32 %v649_v61, %v619_v59 }
 0x136   : > { %v580_v46 = vadd.f32 %v579_v42, %v1011_v31  ;;  %v651_v0 = vadd.f32 %v650_v62, %v620_v44 }
 0x138   : > { %v581_v40 = vadd.f32 %v989_v25, %v580_v46  ;;  %v652_v2 = vadd.f32 %v651_v0, %v621_v54  ;;  %v603_v46 = vld [vmem:[%s1174_s3 + $0x1] sm:$0x1] }
 0x13a   : > { %v582_v50 = vadd.f32 %v1005_v29, %v581_v40  ;;  %v653_v4 = vadd.f32 %v652_v2, %v622_v48 }
 0x13c   : > { %v583_v63 = vadd.f32 %v582_v50, %v1024_v35  ;;  %v654_v6 = vadd.f32 %v653_v4, %v623_v1 }
 0x13e   : > { %v584_v52 = vadd.f32 %v583_v63, %v1037_v39  ;;  %v655_v8 = vadd.f32 %v654_v6, %v624_v3 }
 0x140   : > { %v585_v27 = vadd.f32 %v1018_v33, %v584_v52  ;;  %v656_v10 = vadd.f32 %v655_v8, %v625_v5 }
 0x142   : > { %v586_v31 = vadd.f32 %v1031_v37, %v585_v27  ;;  %v657_v12 = vadd.f32 %v656_v10, %v626_v7 }
 0x144   : > { %v587_v25 = vadd.f32 %v586_v31, %v1050_v43  ;;  %v658_v14 = vadd.f32 %v657_v12, %v627_v9 }
 0x146   : > { %v588_v29 = vadd.f32 %v587_v25, %v1060_v47  ;;  %v659_v16 = vadd.f32 %v658_v14, %v628_v11 }
 0x148   : > { %v589_v35 = vadd.f32 %v1044_v41, %v588_v29  ;;  %v660_v18 = vadd.f32 %v659_v16, %v629_v13 }
 0x14a   : > { %v590_v39 = vadd.f32 %v1055_v45, %v589_v35  ;;  %v661_v20 = vadd.f32 %v660_v18, %v630_v15  ;;  %v635_v45 = vmul.f32 %v1075_v53, %v1075_v53 }
 0x14c   : > { %v591_v33 = vadd.f32 %v590_v39, %v1070_v51  ;;  %v662_v22 = vadd.f32 %v661_v20, %v631_v17 }
 0x14e   : > { %v592_v37 = vadd.f32 %v591_v33, %v1080_v55  ;;  %v663_v24 = vadd.f32 %v662_v22, %v632_v19  ;;  %v563_v55 = vld [vmem:[%s1174_s3] sm:$0x1] }
 0x150   : > { %v593_v43 = vadd.f32 %v1065_v49, %v592_v37  ;;  %v664_v28 = vadd.f32 %v663_v24, %v633_v21 }
 0x152   : > { %v594_v47 = vadd.f32 %v1075_v53, %v593_v43  ;;  %v665_v32 = vadd.f32 %v664_v28, %v634_v23 }
 0x154   : > { %v595_v41 = vrot.slane %v594_v47, 4  ;;  %v666_v34 = vadd.f32 %v665_v32, %v635_v45 }
 0x156   : > { %v596_v26 = vadd.f32 %v595_v41, %v594_v47  ;;  %v667_v38 = vrot.slane %v666_v34, 4 }
 0x158   : > { %v597_v30 = vrot.slane %v596_v26, 2  ;;  %v668_v42 = vadd.f32 %v667_v38, %v666_v34 }
 0x15a   : > { %v598_v51 = vadd.f32 %v597_v30, %v596_v26  ;;  %v669_v49 = vrot.slane %v668_v42, 2 }
 0x15c   : > { %v599_v36 = vrot.slane %v598_v51, 1  ;;  %v670_v53 = vadd.f32 %v669_v49, %v668_v42 }
 0x15e   : > { %v600_v56 = vadd.f32 %v599_v36, %v598_v51  ;;  %v671_v58 = vrot.slane %v670_v53, 1 }
 0x160   : > { %v601_v57 = vadd.f32 %v600_v56, %v563_v55  ;;  %v672_v59 = vadd.f32 %v671_v58, %v670_v53 }
 0x162   : > { %602 = vst [vmem:[%s1174_s3] sm:$0x1] %v601_v57  ;;  %v673_v60 = vadd.f32 %v672_v59, %v603_v46 }
 0x164   : > { %674 = vst [vmem:[%s1174_s3 + $0x1] sm:$0x1] %v673_v60 }
 0x165 PF: > { %s14_s12 = sadd.s32 1, %s900_s12  }
 0x166   : > { %p11_p5 = scmp.ge.s32.totalorder %s14_s12, 4  }
 0x168   :  { %13 = sbr.rel (!%p11_p5) target bundleno = 1 (0x1), region = 70 }

</bundles_post_ra>
